<compile_context>
chip_gen: v7x
topology: tpu7x:2x2x1
jax: 0.10.0
libtpu: 0.0.40
codegen_flags: <defaults>
</compile_context>

<pallas_src>
import functools

import jax
import jax.numpy as jnp
from jax import lax
from jax.experimental import pallas as pl
from jax.experimental.pallas import tpu as pltpu

EPS = 1e-5


# ----------------------------------------------------------------------------
# Fused Pallas kernel: norm conv + 4 dilated convs (+BN+ReLU) + final BN+ReLU
# ----------------------------------------------------------------------------
def _conv_block_kernel(x_ref, col_ref, wn_ref, b1_ref, wa_ref, shin_ref,
                       os_ref, osh_ref, out_ref, x1pad_ref,
                       *, dilations, H, W, cout, pad_h):
    HW = H * W
    n_norm = wn_ref.shape[0]                                # 4

    # ---- 1x1 norm conv (no activation) ----
    x = x_ref[0, :, :]                                      # (Cin, HW)
    x1 = jnp.dot(wn_ref[...], x,
                 preferred_element_type=jnp.float32) + b1_ref[...]   # (4, HW)

    # concat slot 0: final BN + ReLU applied to raw x1
    out_ref[0, 0:n_norm, :] = jnp.maximum(
        x1 * os_ref[0:n_norm, :] + osh_ref[0:n_norm, :], 0.0)

    # ---- H-direction zero-padded copy of x1 for the dilated taps ----
    x1pad_ref[...] = jnp.zeros_like(x1pad_ref)
    x1pad_ref[:, pad_h * W:pad_h * W + HW] = x1

    col = col_ref[...]                                      # (1, HW) int32

    # ---- ASPP branches: dilated 3x3 conv (+bias+BN folded) + ReLU,
    #      then final BN + ReLU, written to their channel-offset rows ----
    for b, d in enumerate(dilations):
        mask_l = col < d                  # left-shifted taps wrap these lanes
        mask_r = col >= (W - d)           # right-shifted taps wrap these lanes
        acc = jnp.zeros((cout, HW), jnp.float32)
        for ky in range(3):
            for kx in range(3):
                dyo = (ky - 1) * d
                dxo = (kx - 1) * d
                start = (pad_h + dyo) * W + dxo             # static, >= 0
                win = x1pad_ref[:, start:start + HW]        # (4, HW)
                if dxo > 0:
                    win = jnp.where(mask_r, 0.0, win)       # emulate W zero-pad
                elif dxo < 0:
                    win = jnp.where(mask_l, 0.0, win)
                acc = acc + jnp.dot(wa_ref[b, ky * 3 + kx, :, :], win,
                                    preferred_element_type=jnp.float32)
        y = jnp.maximum(acc + shin_ref[b, :, :], 0.0)       # conv bias+BN+ReLU
        r0 = n_norm + b * cout
        out_ref[0, r0:r0 + cout, :] = jnp.maximum(          # final BN + ReLU
            y * os_ref[r0:r0 + cout, :] + osh_ref[r0:r0 + cout, :], 0.0)


def conv_block_forward(x_nchw, params):
    N, Cin, H, W = x_nchw.shape
    HW = H * W
    dilations = tuple(params['dilations'])
    assert params['padding'] == 1, "spatial size must be preserved for concat"
    assert max(dilations) < W
    pad_h = max(dilations) + 1

    n_norm = params['norm_w'].shape[0]               # 4
    n_br = params['aspp_w'].shape[0]
    cout = params['aspp_w'].shape[2]
    Ctot = n_norm + n_br * cout

    x_flat = x_nchw.reshape(N, Cin, HW)              # free reshape (NCHW row-major)
    col_idx = (jnp.arange(HW, dtype=jnp.int32) % W).reshape(1, HW)

    kernel = functools.partial(_conv_block_kernel, dilations=dilations,
                               H=H, W=W, cout=cout, pad_h=pad_h)

    out = pl.pallas_call(
        kernel,
        out_shape=jax.ShapeDtypeStruct((N, Ctot, HW), jnp.float32),
        grid_spec=pltpu.PrefetchScalarGridSpec(
            num_scalar_prefetch=0,
            grid=(N,),
            in_specs=[
                pl.BlockSpec((1, Cin, HW), lambda n: (n, 0, 0)),
                pl.BlockSpec((1, HW), lambda n: (0, 0)),
                pl.BlockSpec((n_norm, Cin), lambda n: (0, 0)),
                pl.BlockSpec((n_norm, 1), lambda n: (0, 0)),
                pl.BlockSpec((n_br, 9, cout, n_norm), lambda n: (0, 0, 0, 0)),
                pl.BlockSpec((n_br, cout, 1), lambda n: (0, 0, 0)),
                pl.BlockSpec((Ctot, 1), lambda n: (0, 0)),
                pl.BlockSpec((Ctot, 1), lambda n: (0, 0)),
            ],
            out_specs=pl.BlockSpec((1, Ctot, HW), lambda n: (n, 0, 0)),
            scratch_shapes=[
                pltpu.VMEM((n_norm, (H + 2 * pad_h) * W), jnp.float32)],
        ),
        compiler_params=pltpu.CompilerParams(
            dimension_semantics=("parallel",)),
    )(x_flat, col_idx, params['norm_w'], params['norm_b'],
      params['aspp_w'], params['aspp_shift_in'],
      params['bn_out_scale'], params['bn_out_shift'])

    return out.reshape(N, Ctot, H, W)                # free reshape back to NCHW


# ----------------------------------------------------------------------------
# Host-side parameter folding (conv bias + eval-mode BN -> weights & shifts)
# ----------------------------------------------------------------------------
def fold_params(raw, Cin):
    def fold_bn(gamma, beta, mean, var):
        scale = gamma / jnp.sqrt(var + EPS)
        shift = beta - mean * scale
        return scale, shift

    wa_list, shin_list = [], []
    for w4, b, (g, be, m, v) in zip(raw['aspp_w4'], raw['aspp_b'],
                                    raw['aspp_bn']):
        s, sh = fold_bn(g, be, m, v)
        co, ci = w4.shape[0], w4.shape[1]
        # fold BN scale into the weight rows; flatten taps (ky,kx) -> t
        wf = (w4 * s.reshape(-1, 1, 1, 1)).transpose(2, 3, 0, 1).reshape(9, co, ci)
        wa_list.append(wf)
        shin_list.append((s * b + sh).reshape(-1, 1))
    so, sho = fold_bn(*raw['bn_out'])
    return {
        'dilations': raw['dilations'],
        'padding': raw['padding'],
        'norm_w': raw['norm_w4'].reshape(raw['norm_w4'].shape[0], Cin),
        'norm_b': raw['norm_b'].reshape(-1, 1),
        'aspp_w': jnp.stack(wa_list, axis=0),            # (n_br, 9, Cout, 4)
        'aspp_shift_in': jnp.stack(shin_list, axis=0),   # (n_br, Cout, 1)
        'bn_out_scale': so.reshape(-1, 1),
        'bn_out_shift': sho.reshape(-1, 1),
    }


# ----------------------------------------------------------------------------
# Pure-JAX reference (for correctness check only)
# ----------------------------------------------------------------------------
def reference_forward(x, raw):
    def conv(x, w, b, dilation, pad):
        y = lax.conv_general_dilated(
            x, w, window_strides=(1, 1),
            padding=[(pad, pad), (pad, pad)],
            rhs_dilation=(dilation, dilation),
            dimension_numbers=('NCHW', 'OIHW', 'NCHW'))
        return y + b.reshape(1, -1, 1, 1)

    def bn(x, gamma, beta, mean, var):
        return ((x - mean.reshape(1, -1, 1, 1))
                / jnp.sqrt(var.reshape(1, -1, 1, 1) + EPS)
                * gamma.reshape(1, -1, 1, 1) + beta.reshape(1, -1, 1, 1))

    x1 = conv(x, raw['norm_w4'], raw['norm_b'], 1, 0)
    outs = [x1]
    for i, d in enumerate(raw['dilations']):
        pad = raw['padding'] + d - 1
        y = conv(x1, raw['aspp_w4'][i], raw['aspp_b'][i], d, pad)
        y = jnp.maximum(bn(y, *raw['aspp_bn'][i]), 0.0)
        outs.append(y)
    cat = jnp.concatenate(outs, axis=1)
    return jnp.maximum(bn(cat, *raw['bn_out']), 0.0)


# ----------------------------------------------------------------------------
# Main
# ----------------------------------------------------------------------------
if __name__ == "__main__":
    key = jax.random.PRNGKey(0)
    ki = iter(jax.random.split(key, 64))

    def nrm(shape, s=0.1):
        return s * jax.random.normal(next(ki), shape, jnp.float32)

    # ConvBlock config: forward feeds x1 (4 channels) into every aspp branch,
    # which only type-checks when out_channels[0:3] == 4 -> use [4,4,4,4].
    N, Cin, H, W = 2, 4, 16, 16
    out_channels = [4, 4, 4, 4]
    dilations = [1, 2, 3, 4]
    padding = 1
    Ctot = 4 + sum(out_channels)                     # 20

    raw = {'dilations': dilations, 'padding': padding}
    raw['norm_w4'] = nrm((4, Cin, 1, 1), 0.3)
    raw['norm_b'] = nrm((4,), 0.1)
    raw['aspp_w4'], raw['aspp_b'], raw['aspp_bn'] = [], [], []
    for co in out_channels:
        raw['aspp_w4'].append(nrm((co, 4, 3, 3), 0.3))
        raw['aspp_b'].append(nrm((co,), 0.1))
        gamma = 1.0 + 0.1 * jax.random.normal(next(ki), (co,), jnp.float32)
        beta = nrm((co,), 0.1)
        mean = nrm((co,), 0.1)
        var = jax.random.uniform(next(ki), (co,), jnp.float32, 0.5, 1.5)
        raw['aspp_bn'].append((gamma, beta, mean, var))
    gamma_o = 1.0 + 0.1 * jax.random.normal(next(ki), (Ctot,), jnp.float32)
    beta_o = nrm((Ctot,), 0.1)
    mean_o = nrm((Ctot,), 0.1)
    var_o = jax.random.uniform(next(ki), (Ctot,), jnp.float32, 0.5, 1.5)
    raw['bn_out'] = (gamma_o, beta_o, mean_o, var_o)

    params = fold_params(raw, Cin)
    x = jax.random.normal(next(ki), (N, Cin, H, W), jnp.float32)

    out = conv_block_forward(x, params)
    out = jax.block_until_ready(out)

    ref = reference_forward(x, raw)
    assert out.shape == (N, Ctot, H, W), out.shape
    err = float(jnp.max(jnp.abs(out - ref)))
    if err < 1e-3:
        print("KERNEL_OK")
    else:
        print("MISMATCH", err)
</pallas_src>

<mosaic_0001>
module attributes {stable_mosaic.version = 11 : i64} {
  func.func @_conv_block_kernel(%arg0: i32, %arg1: memref<1x4x256xf32, #tpu.memory_space<vmem>>, %arg2: memref<1x256xi32, #tpu.memory_space<vmem>>, %arg3: memref<4x4xf32, #tpu.memory_space<vmem>>, %arg4: memref<4x1xf32, #tpu.memory_space<vmem>>, %arg5: memref<4x9x4x4xf32, #tpu.memory_space<vmem>>, %arg6: memref<4x4x1xf32, #tpu.memory_space<vmem>>, %arg7: memref<20x1xf32, #tpu.memory_space<vmem>>, %arg8: memref<20x1xf32, #tpu.memory_space<vmem>>, %arg9: memref<1x20x256xf32, #tpu.memory_space<vmem>>, %arg10: memref<4x416xf32, #tpu.memory_space<vmem>>) attributes {dimension_semantics = [#tpu.dimension_semantics<parallel>], iteration_bounds = array<i64: 2>, scalar_prefetch = 0 : i64, scratch_operands = 1 : i64, tpu.core_type = #tpu.core_type<tc>, window_params = [{transform_indices = @transform_0, window_bounds = array<i64: 1, 4, 256>}, {pipeline_mode = #tpu.pipeline_mode<synchronous>, transform_indices = @transform_1, window_bounds = array<i64: 1, 256>}, {pipeline_mode = #tpu.pipeline_mode<synchronous>, transform_indices = @transform_2, window_bounds = array<i64: 4, 4>}, {pipeline_mode = #tpu.pipeline_mode<synchronous>, transform_indices = @transform_3, window_bounds = array<i64: 4, 1>}, {pipeline_mode = #tpu.pipeline_mode<synchronous>, transform_indices = @transform_4, window_bounds = array<i64: 4, 9, 4, 4>}, {pipeline_mode = #tpu.pipeline_mode<synchronous>, transform_indices = @transform_5, window_bounds = array<i64: 4, 4, 1>}, {pipeline_mode = #tpu.pipeline_mode<synchronous>, transform_indices = @transform_6, window_bounds = array<i64: 20, 1>}, {pipeline_mode = #tpu.pipeline_mode<synchronous>, transform_indices = @transform_7, window_bounds = array<i64: 20, 1>}, {transform_indices = @transform_8, window_bounds = array<i64: 1, 20, 256>}]} {
    %c0 = arith.constant 0 : index
    %c0_0 = arith.constant 0 : index
    %c0_1 = arith.constant 0 : index
    %0 = vector.load %arg1[%c0, %c0_0, %c0_1] : memref<1x4x256xf32, #tpu.memory_space<vmem>>, vector<1x4x256xf32>
    %1 = vector.shape_cast %0 : vector<1x4x256xf32> to vector<4x256xf32>
    %c0_2 = arith.constant 0 : index
    %c0_3 = arith.constant 0 : index
    %2 = vector.load %arg3[%c0_2, %c0_3] : memref<4x4xf32, #tpu.memory_space<vmem>>, vector<4x4xf32>
    %cst = arith.constant dense<0.000000e+00> : vector<4x256xf32>
    %3 = tpu.matmul %2, %1, %cst {dimension_numbers = #tpu.dot_dimension_numbers<[1], [0], [0], [1], [0, 0, 1, 1], [], []>} : vector<4x4xf32>, vector<4x256xf32>, vector<4x256xf32> -> vector<4x256xf32>
    %c0_4 = arith.constant 0 : index
    %c0_5 = arith.constant 0 : index
    %4 = vector.load %arg4[%c0_4, %c0_5] : memref<4x1xf32, #tpu.memory_space<vmem>>, vector<4x1xf32>
    %5 = vector.broadcast %4 : vector<4x1xf32> to vector<4x256xf32>
    %6 = arith.addf %3, %5 : vector<4x256xf32>
    %c0_6 = arith.constant 0 : index
    %c0_7 = arith.constant 0 : index
    %7 = vector.load %arg7[%c0_6, %c0_7] : memref<20x1xf32, #tpu.memory_space<vmem>>, vector<4x1xf32>
    %8 = vector.broadcast %7 : vector<4x1xf32> to vector<4x256xf32>
    %9 = arith.mulf %6, %8 : vector<4x256xf32>
    %c0_8 = arith.constant 0 : index
    %c0_9 = arith.constant 0 : index
    %10 = vector.load %arg8[%c0_8, %c0_9] : memref<20x1xf32, #tpu.memory_space<vmem>>, vector<4x1xf32>
    %11 = vector.broadcast %10 : vector<4x1xf32> to vector<4x256xf32>
    %12 = arith.addf %9, %11 : vector<4x256xf32>
    %cst_10 = arith.constant 0.000000e+00 : f32
    %13 = vector.broadcast %cst_10 : f32 to vector<4x256xf32>
    %14 = arith.maximumf %12, %13 : vector<4x256xf32>
    %c0_11 = arith.constant 0 : index
    %c0_12 = arith.constant 0 : index
    %c0_13 = arith.constant 0 : index
    %15 = vector.load %arg9[%c0_11, %c0_12, %c0_13] : memref<1x20x256xf32, #tpu.memory_space<vmem>>, vector<1x4x256xf32>
    %16 = vector.shape_cast %15 : vector<1x4x256xf32> to vector<4x256xf32>
    %17 = vector.shape_cast %14 : vector<4x256xf32> to vector<1x4x256xf32>
    tpu.vector_store %arg9[%c0_11, %c0_12, %c0_13], %17 {strides = array<i32>} : memref<1x20x256xf32, #tpu.memory_space<vmem>>, vector<1x4x256xf32>,
    %cst_14 = arith.constant 0.000000e+00 : f32
    %18 = vector.broadcast %cst_14 : f32 to vector<4x416xf32>
    %c0_15 = arith.constant 0 : index
    %c0_16 = arith.constant 0 : index
    %19 = vector.load %arg10[%c0_15, %c0_16] : memref<4x416xf32, #tpu.memory_space<vmem>>, vector<4x416xf32>
    tpu.vector_store %arg10[%c0_15, %c0_16], %18 {strides = array<i32>} : memref<4x416xf32, #tpu.memory_space<vmem>>, vector<4x416xf32>,
    %c0_17 = arith.constant 0 : index
    %c80 = arith.constant 80 : index
    %20 = vector.load %arg10[%c0_17, %c80] : memref<4x416xf32, #tpu.memory_space<vmem>>, vector<4x256xf32>
    tpu.vector_store %arg10[%c0_17, %c80], %6 {strides = array<i32>} : memref<4x416xf32, #tpu.memory_space<vmem>>, vector<4x256xf32>,
    %c0_18 = arith.constant 0 : index
    %c0_19 = arith.constant 0 : index
    %21 = vector.load %arg2[%c0_18, %c0_19] : memref<1x256xi32, #tpu.memory_space<vmem>>, vector<1x256xi32>
    %c1_i32 = arith.constant 1 : i32
    %22 = vector.broadcast %c1_i32 : i32 to vector<1x256xi32>
    %23 = arith.cmpi slt, %21, %22 : vector<1x256xi32>
    %c15_i32 = arith.constant 15 : i32
    %24 = vector.broadcast %c15_i32 : i32 to vector<1x256xi32>
    %25 = arith.cmpi sge, %21, %24 : vector<1x256xi32>
    %cst_20 = arith.constant 0.000000e+00 : f32
    %26 = vector.broadcast %cst_20 : f32 to vector<4x256xf32>
    %c0_21 = arith.constant 0 : index
    %c63 = arith.constant 63 : index
    %27 = vector.load %arg10[%c0_21, %c63] : memref<4x416xf32, #tpu.memory_space<vmem>>, vector<4x256xf32>
    %cst_22 = arith.constant 0.000000e+00 : f32
    %28 = vector.shape_cast %23 : vector<1x256xi1> to vector<1x256xi1>
    %29 = vector.broadcast %28 : vector<1x256xi1> to vector<4x256xi1>
    %30 = vector.broadcast %cst_22 : f32 to vector<4x256xf32>
    %31 = arith.select %29, %30, %27 : vector<4x256xi1>, vector<4x256xf32>
    %c0_23 = arith.constant 0 : index
    %c0_24 = arith.constant 0 : index
    %c0_25 = arith.constant 0 : index
    %c0_26 = arith.constant 0 : index
    %32 = vector.load %arg5[%c0_23, %c0_24, %c0_25, %c0_26] : memref<4x9x4x4xf32, #tpu.memory_space<vmem>>, vector<1x1x4x4xf32>
    %33 = vector.shape_cast %32 : vector<1x1x4x4xf32> to vector<4x4xf32>
    %cst_27 = arith.constant dense<0.000000e+00> : vector<4x256xf32>
    %34 = tpu.matmul %33, %31, %cst_27 {dimension_numbers = #tpu.dot_dimension_numbers<[1], [0], [0], [1], [0, 0, 1, 1], [], []>} : vector<4x4xf32>, vector<4x256xf32>, vector<4x256xf32> -> vector<4x256xf32>
    %35 = arith.addf %26, %34 : vector<4x256xf32>
    %c0_28 = arith.constant 0 : index
    %c64 = arith.constant 64 : index
    %36 = vector.load %arg10[%c0_28, %c64] : memref<4x416xf32, #tpu.memory_space<vmem>>, vector<4x256xf32>
    %c0_29 = arith.constant 0 : index
    %c1 = arith.constant 1 : index
    %c0_30 = arith.constant 0 : index
    %c0_31 = arith.constant 0 : index
    %37 = vector.load %arg5[%c0_29, %c1, %c0_30, %c0_31] : memref<4x9x4x4xf32, #tpu.memory_space<vmem>>, vector<1x1x4x4xf32>
    %38 = vector.shape_cast %37 : vector<1x1x4x4xf32> to vector<4x4xf32>
    %cst_32 = arith.constant dense<0.000000e+00> : vector<4x256xf32>
    %39 = tpu.matmul %38, %36, %cst_32 {dimension_numbers = #tpu.dot_dimension_numbers<[1], [0], [0], [1], [0, 0, 1, 1], [], []>} : vector<4x4xf32>, vector<4x256xf32>, vector<4x256xf32> -> vector<4x256xf32>
    %40 = arith.addf %35, %39 : vector<4x256xf32>
    %c0_33 = arith.constant 0 : index
    %c65 = arith.constant 65 : index
    %41 = vector.load %arg10[%c0_33, %c65] : memref<4x416xf32, #tpu.memory_space<vmem>>, vector<4x256xf32>
    %cst_34 = arith.constant 0.000000e+00 : f32
    %42 = vector.shape_cast %25 : vector<1x256xi1> to vector<1x256xi1>
    %43 = vector.broadcast %42 : vector<1x256xi1> to vector<4x256xi1>
    %44 = vector.broadcast %cst_34 : f32 to vector<4x256xf32>
    %45 = arith.select %43, %44, %41 : vector<4x256xi1>, vector<4x256xf32>
    %c0_35 = arith.constant 0 : index
    %c2 = arith.constant 2 : index
    %c0_36 = arith.constant 0 : index
    %c0_37 = arith.constant 0 : index
    %46 = vector.load %arg5[%c0_35, %c2, %c0_36, %c0_37] : memref<4x9x4x4xf32, #tpu.memory_space<vmem>>, vector<1x1x4x4xf32>
    %47 = vector.shape_cast %46 : vector<1x1x4x4xf32> to vector<4x4xf32>
    %cst_38 = arith.constant dense<0.000000e+00> : vector<4x256xf32>
    %48 = tpu.matmul %47, %45, %cst_38 {dimension_numbers = #tpu.dot_dimension_numbers<[1], [0], [0], [1], [0, 0, 1, 1], [], []>} : vector<4x4xf32>, vector<4x256xf32>, vector<4x256xf32> -> vector<4x256xf32>
    %49 = arith.addf %40, %48 : vector<4x256xf32>
    %c0_39 = arith.constant 0 : index
    %c79 = arith.constant 79 : index
    %50 = vector.load %arg10[%c0_39, %c79] : memref<4x416xf32, #tpu.memory_space<vmem>>, vector<4x256xf32>
    %cst_40 = arith.constant 0.000000e+00 : f32
    %51 = vector.shape_cast %23 : vector<1x256xi1> to vector<1x256xi1>
    %52 = vector.broadcast %51 : vector<1x256xi1> to vector<4x256xi1>
    %53 = vector.broadcast %cst_40 : f32 to vector<4x256xf32>
    %54 = arith.select %52, %53, %50 : vector<4x256xi1>, vector<4x256xf32>
    %c0_41 = arith.constant 0 : index
    %c3 = arith.constant 3 : index
    %c0_42 = arith.constant 0 : index
    %c0_43 = arith.constant 0 : index
    %55 = vector.load %arg5[%c0_41, %c3, %c0_42, %c0_43] : memref<4x9x4x4xf32, #tpu.memory_space<vmem>>, vector<1x1x4x4xf32>
    %56 = vector.shape_cast %55 : vector<1x1x4x4xf32> to vector<4x4xf32>
    %cst_44 = arith.constant dense<0.000000e+00> : vector<4x256xf32>
    %57 = tpu.matmul %56, %54, %cst_44 {dimension_numbers = #tpu.dot_dimension_numbers<[1], [0], [0], [1], [0, 0, 1, 1], [], []>} : vector<4x4xf32>, vector<4x256xf32>, vector<4x256xf32> -> vector<4x256xf32>
    %58 = arith.addf %49, %57 : vector<4x256xf32>
    %c0_45 = arith.constant 0 : index
    %c80_46 = arith.constant 80 : index
    %59 = vector.load %arg10[%c0_45, %c80_46] : memref<4x416xf32, #tpu.memory_space<vmem>>, vector<4x256xf32>
    %c0_47 = arith.constant 0 : index
    %c4 = arith.constant 4 : index
    %c0_48 = arith.constant 0 : index
    %c0_49 = arith.constant 0 : index
    %60 = vector.load %arg5[%c0_47, %c4, %c0_48, %c0_49] : memref<4x9x4x4xf32, #tpu.memory_space<vmem>>, vector<1x1x4x4xf32>
    %61 = vector.shape_cast %60 : vector<1x1x4x4xf32> to vector<4x4xf32>
    %cst_50 = arith.constant dense<0.000000e+00> : vector<4x256xf32>
    %62 = tpu.matmul %61, %59, %cst_50 {dimension_numbers = #tpu.dot_dimension_numbers<[1], [0], [0], [1], [0, 0, 1, 1], [], []>} : vector<4x4xf32>, vector<4x256xf32>, vector<4x256xf32> -> vector<4x256xf32>
    %63 = arith.addf %58, %62 : vector<4x256xf32>
    %c0_51 = arith.constant 0 : index
    %c81 = arith.constant 81 : index
    %64 = vector.load %arg10[%c0_51, %c81] : memref<4x416xf32, #tpu.memory_space<vmem>>, vector<4x256xf32>
    %cst_52 = arith.constant 0.000000e+00 : f32
    %65 = vector.shape_cast %25 : vector<1x256xi1> to vector<1x256xi1>
    %66 = vector.broadcast %65 : vector<1x256xi1> to vector<4x256xi1>
    %67 = vector.broadcast %cst_52 : f32 to vector<4x256xf32>
    %68 = arith.select %66, %67, %64 : vector<4x256xi1>, vector<4x256xf32>
    %c0_53 = arith.constant 0 : index
    %c5 = arith.constant 5 : index
    %c0_54 = arith.constant 0 : index
    %c0_55 = arith.constant 0 : index
    %69 = vector.load %arg5[%c0_53, %c5, %c0_54, %c0_55] : memref<4x9x4x4xf32, #tpu.memory_space<vmem>>, vector<1x1x4x4xf32>
    %70 = vector.shape_cast %69 : vector<1x1x4x4xf32> to vector<4x4xf32>
    %cst_56 = arith.constant dense<0.000000e+00> : vector<4x256xf32>
    %71 = tpu.matmul %70, %68, %cst_56 {dimension_numbers = #tpu.dot_dimension_numbers<[1], [0], [0], [1], [0, 0, 1, 1], [], []>} : vector<4x4xf32>, vector<4x256xf32>, vector<4x256xf32> -> vector<4x256xf32>
    %72 = arith.addf %63, %71 : vector<4x256xf32>
    %c0_57 = arith.constant 0 : index
    %c95 = arith.constant 95 : index
    %73 = vector.load %arg10[%c0_57, %c95] : memref<4x416xf32, #tpu.memory_space<vmem>>, vector<4x256xf32>
    %cst_58 = arith.constant 0.000000e+00 : f32
    %74 = vector.shape_cast %23 : vector<1x256xi1> to vector<1x256xi1>
    %75 = vector.broadcast %74 : vector<1x256xi1> to vector<4x256xi1>
    %76 = vector.broadcast %cst_58 : f32 to vector<4x256xf32>
    %77 = arith.select %75, %76, %73 : vector<4x256xi1>, vector<4x256xf32>
    %c0_59 = arith.constant 0 : index
    %c6 = arith.constant 6 : index
    %c0_60 = arith.constant 0 : index
    %c0_61 = arith.constant 0 : index
    %78 = vector.load %arg5[%c0_59, %c6, %c0_60, %c0_61] : memref<4x9x4x4xf32, #tpu.memory_space<vmem>>, vector<1x1x4x4xf32>
    %79 = vector.shape_cast %78 : vector<1x1x4x4xf32> to vector<4x4xf32>
    %cst_62 = arith.constant dense<0.000000e+00> : vector<4x256xf32>
    %80 = tpu.matmul %79, %77, %cst_62 {dimension_numbers = #tpu.dot_dimension_numbers<[1], [0], [0], [1], [0, 0, 1, 1], [], []>} : vector<4x4xf32>, vector<4x256xf32>, vector<4x256xf32> -> vector<4x256xf32>
    %81 = arith.addf %72, %80 : vector<4x256xf32>
    %c0_63 = arith.constant 0 : index
    %c96 = arith.constant 96 : index
    %82 = vector.load %arg10[%c0_63, %c96] : memref<4x416xf32, #tpu.memory_space<vmem>>, vector<4x256xf32>
    %c0_64 = arith.constant 0 : index
    %c7 = arith.constant 7 : index
    %c0_65 = arith.constant 0 : index
    %c0_66 = arith.constant 0 : index
    %83 = vector.load %arg5[%c0_64, %c7, %c0_65, %c0_66] : memref<4x9x4x4xf32, #tpu.memory_space<vmem>>, vector<1x1x4x4xf32>
    %84 = vector.shape_cast %83 : vector<1x1x4x4xf32> to vector<4x4xf32>
    %cst_67 = arith.constant dense<0.000000e+00> : vector<4x256xf32>
    %85 = tpu.matmul %84, %82, %cst_67 {dimension_numbers = #tpu.dot_dimension_numbers<[1], [0], [0], [1], [0, 0, 1, 1], [], []>} : vector<4x4xf32>, vector<4x256xf32>, vector<4x256xf32> -> vector<4x256xf32>
    %86 = arith.addf %81, %85 : vector<4x256xf32>
    %c0_68 = arith.constant 0 : index
    %c97 = arith.constant 97 : index
    %87 = vector.load %arg10[%c0_68, %c97] : memref<4x416xf32, #tpu.memory_space<vmem>>, vector<4x256xf32>
    %cst_69 = arith.constant 0.000000e+00 : f32
    %88 = vector.shape_cast %25 : vector<1x256xi1> to vector<1x256xi1>
    %89 = vector.broadcast %88 : vector<1x256xi1> to vector<4x256xi1>
    %90 = vector.broadcast %cst_69 : f32 to vector<4x256xf32>
    %91 = arith.select %89, %90, %87 : vector<4x256xi1>, vector<4x256xf32>
    %c0_70 = arith.constant 0 : index
    %c8 = arith.constant 8 : index
    %c0_71 = arith.constant 0 : index
    %c0_72 = arith.constant 0 : index
    %92 = vector.load %arg5[%c0_70, %c8, %c0_71, %c0_72] : memref<4x9x4x4xf32, #tpu.memory_space<vmem>>, vector<1x1x4x4xf32>
    %93 = vector.shape_cast %92 : vector<1x1x4x4xf32> to vector<4x4xf32>
    %cst_73 = arith.constant dense<0.000000e+00> : vector<4x256xf32>
    %94 = tpu.matmul %93, %91, %cst_73 {dimension_numbers = #tpu.dot_dimension_numbers<[1], [0], [0], [1], [0, 0, 1, 1], [], []>} : vector<4x4xf32>, vector<4x256xf32>, vector<4x256xf32> -> vector<4x256xf32>
    %95 = arith.addf %86, %94 : vector<4x256xf32>
    %c0_74 = arith.constant 0 : index
    %c0_75 = arith.constant 0 : index
    %c0_76 = arith.constant 0 : index
    %96 = vector.load %arg6[%c0_74, %c0_75, %c0_76] : memref<4x4x1xf32, #tpu.memory_space<vmem>>, vector<1x4x1xf32>
    %97 = vector.shape_cast %96 : vector<1x4x1xf32> to vector<4x1xf32>
    %98 = vector.broadcast %97 : vector<4x1xf32> to vector<4x256xf32>
    %99 = arith.addf %95, %98 : vector<4x256xf32>
    %cst_77 = arith.constant 0.000000e+00 : f32
    %100 = vector.broadcast %cst_77 : f32 to vector<4x256xf32>
    %101 = arith.maximumf %99, %100 : vector<4x256xf32>
    %c4_78 = arith.constant 4 : index
    %c0_79 = arith.constant 0 : index
    %102 = vector.load %arg7[%c4_78, %c0_79] : memref<20x1xf32, #tpu.memory_space<vmem>>, vector<4x1xf32>
    %103 = vector.broadcast %102 : vector<4x1xf32> to vector<4x256xf32>
    %104 = arith.mulf %101, %103 : vector<4x256xf32>
    %c4_80 = arith.constant 4 : index
    %c0_81 = arith.constant 0 : index
    %105 = vector.load %arg8[%c4_80, %c0_81] : memref<20x1xf32, #tpu.memory_space<vmem>>, vector<4x1xf32>
    %106 = vector.broadcast %105 : vector<4x1xf32> to vector<4x256xf32>
    %107 = arith.addf %104, %106 : vector<4x256xf32>
    %cst_82 = arith.constant 0.000000e+00 : f32
    %108 = vector.broadcast %cst_82 : f32 to vector<4x256xf32>
    %109 = arith.maximumf %107, %108 : vector<4x256xf32>
    %c0_83 = arith.constant 0 : index
    %c4_84 = arith.constant 4 : index
    %c0_85 = arith.constant 0 : index
    %110 = vector.load %arg9[%c0_83, %c4_84, %c0_85] : memref<1x20x256xf32, #tpu.memory_space<vmem>>, vector<1x4x256xf32>
    %111 = vector.shape_cast %110 : vector<1x4x256xf32> to vector<4x256xf32>
    %112 = vector.shape_cast %109 : vector<4x256xf32> to vector<1x4x256xf32>
    tpu.vector_store %arg9[%c0_83, %c4_84, %c0_85], %112 {strides = array<i32>} : memref<1x20x256xf32, #tpu.memory_space<vmem>>, vector<1x4x256xf32>,
    %c2_i32 = arith.constant 2 : i32
    %113 = vector.broadcast %c2_i32 : i32 to vector<1x256xi32>
    %114 = arith.cmpi slt, %21, %113 : vector<1x256xi32>
    %c14_i32 = arith.constant 14 : i32
    %115 = vector.broadcast %c14_i32 : i32 to vector<1x256xi32>
    %116 = arith.cmpi sge, %21, %115 : vector<1x256xi32>
    %cst_86 = arith.constant 0.000000e+00 : f32
    %117 = vector.broadcast %cst_86 : f32 to vector<4x256xf32>
    %c0_87 = arith.constant 0 : index
    %c46 = arith.constant 46 : index
    %118 = vector.load %arg10[%c0_87, %c46] : memref<4x416xf32, #tpu.memory_space<vmem>>, vector<4x256xf32>
    %cst_88 = arith.constant 0.000000e+00 : f32
    %119 = vector.shape_cast %114 : vector<1x256xi1> to vector<1x256xi1>
    %120 = vector.broadcast %119 : vector<1x256xi1> to vector<4x256xi1>
    %121 = vector.broadcast %cst_88 : f32 to vector<4x256xf32>
    %122 = arith.select %120, %121, %118 : vector<4x256xi1>, vector<4x256xf32>
    %c1_89 = arith.constant 1 : index
    %c0_90 = arith.constant 0 : index
    %c0_91 = arith.constant 0 : index
    %c0_92 = arith.constant 0 : index
    %123 = vector.load %arg5[%c1_89, %c0_90, %c0_91, %c0_92] : memref<4x9x4x4xf32, #tpu.memory_space<vmem>>, vector<1x1x4x4xf32>
    %124 = vector.shape_cast %123 : vector<1x1x4x4xf32> to vector<4x4xf32>
    %cst_93 = arith.constant dense<0.000000e+00> : vector<4x256xf32>
    %125 = tpu.matmul %124, %122, %cst_93 {dimension_numbers = #tpu.dot_dimension_numbers<[1], [0], [0], [1], [0, 0, 1, 1], [], []>} : vector<4x4xf32>, vector<4x256xf32>, vector<4x256xf32> -> vector<4x256xf32>
    %126 = arith.addf %117, %125 : vector<4x256xf32>
    %c0_94 = arith.constant 0 : index
    %c48 = arith.constant 48 : index
    %127 = vector.load %arg10[%c0_94, %c48] : memref<4x416xf32, #tpu.memory_space<vmem>>, vector<4x256xf32>
    %c1_95 = arith.constant 1 : index
    %c1_96 = arith.constant 1 : index
    %c0_97 = arith.constant 0 : index
    %c0_98 = arith.constant 0 : index
    %128 = vector.load %arg5[%c1_95, %c1_96, %c0_97, %c0_98] : memref<4x9x4x4xf32, #tpu.memory_space<vmem>>, vector<1x1x4x4xf32>
    %129 = vector.shape_cast %128 : vector<1x1x4x4xf32> to vector<4x4xf32>
    %cst_99 = arith.constant dense<0.000000e+00> : vector<4x256xf32>
    %130 = tpu.matmul %129, %127, %cst_99 {dimension_numbers = #tpu.dot_dimension_numbers<[1], [0], [0], [1], [0, 0, 1, 1], [], []>} : vector<4x4xf32>, vector<4x256xf32>, vector<4x256xf32> -> vector<4x256xf32>
    %131 = arith.addf %126, %130 : vector<4x256xf32>
    %c0_100 = arith.constant 0 : index
    %c50 = arith.constant 50 : index
    %132 = vector.load %arg10[%c0_100, %c50] : memref<4x416xf32, #tpu.memory_space<vmem>>, vector<4x256xf32>
    %cst_101 = arith.constant 0.000000e+00 : f32
    %133 = vector.shape_cast %116 : vector<1x256xi1> to vector<1x256xi1>
    %134 = vector.broadcast %133 : vector<1x256xi1> to vector<4x256xi1>
    %135 = vector.broadcast %cst_101 : f32 to vector<4x256xf32>
    %136 = arith.select %134, %135, %132 : vector<4x256xi1>, vector<4x256xf32>
    %c1_102 = arith.constant 1 : index
    %c2_103 = arith.constant 2 : index
    %c0_104 = arith.constant 0 : index
    %c0_105 = arith.constant 0 : index
    %137 = vector.load %arg5[%c1_102, %c2_103, %c0_104, %c0_105] : memref<4x9x4x4xf32, #tpu.memory_space<vmem>>, vector<1x1x4x4xf32>
    %138 = vector.shape_cast %137 : vector<1x1x4x4xf32> to vector<4x4xf32>
    %cst_106 = arith.constant dense<0.000000e+00> : vector<4x256xf32>
    %139 = tpu.matmul %138, %136, %cst_106 {dimension_numbers = #tpu.dot_dimension_numbers<[1], [0], [0], [1], [0, 0, 1, 1], [], []>} : vector<4x4xf32>, vector<4x256xf32>, vector<4x256xf32> -> vector<4x256xf32>
    %140 = arith.addf %131, %139 : vector<4x256xf32>
    %c0_107 = arith.constant 0 : index
    %c78 = arith.constant 78 : index
    %141 = vector.load %arg10[%c0_107, %c78] : memref<4x416xf32, #tpu.memory_space<vmem>>, vector<4x256xf32>
    %cst_108 = arith.constant 0.000000e+00 : f32
    %142 = vector.shape_cast %114 : vector<1x256xi1> to vector<1x256xi1>
    %143 = vector.broadcast %142 : vector<1x256xi1> to vector<4x256xi1>
    %144 = vector.broadcast %cst_108 : f32 to vector<4x256xf32>
    %145 = arith.select %143, %144, %141 : vector<4x256xi1>, vector<4x256xf32>
    %c1_109 = arith.constant 1 : index
    %c3_110 = arith.constant 3 : index
    %c0_111 = arith.constant 0 : index
    %c0_112 = arith.constant 0 : index
    %146 = vector.load %arg5[%c1_109, %c3_110, %c0_111, %c0_112] : memref<4x9x4x4xf32, #tpu.memory_space<vmem>>, vector<1x1x4x4xf32>
    %147 = vector.shape_cast %146 : vector<1x1x4x4xf32> to vector<4x4xf32>
    %cst_113 = arith.constant dense<0.000000e+00> : vector<4x256xf32>
    %148 = tpu.matmul %147, %145, %cst_113 {dimension_numbers = #tpu.dot_dimension_numbers<[1], [0], [0], [1], [0, 0, 1, 1], [], []>} : vector<4x4xf32>, vector<4x256xf32>, vector<4x256xf32> -> vector<4x256xf32>
    %149 = arith.addf %140, %148 : vector<4x256xf32>
    %c0_114 = arith.constant 0 : index
    %c80_115 = arith.constant 80 : index
    %150 = vector.load %arg10[%c0_114, %c80_115] : memref<4x416xf32, #tpu.memory_space<vmem>>, vector<4x256xf32>
    %c1_116 = arith.constant 1 : index
    %c4_117 = arith.constant 4 : index
    %c0_118 = arith.constant 0 : index
    %c0_119 = arith.constant 0 : index
    %151 = vector.load %arg5[%c1_116, %c4_117, %c0_118, %c0_119] : memref<4x9x4x4xf32, #tpu.memory_space<vmem>>, vector<1x1x4x4xf32>
    %152 = vector.shape_cast %151 : vector<1x1x4x4xf32> to vector<4x4xf32>
    %cst_120 = arith.constant dense<0.000000e+00> : vector<4x256xf32>
    %153 = tpu.matmul %152, %150, %cst_120 {dimension_numbers = #tpu.dot_dimension_numbers<[1], [0], [0], [1], [0, 0, 1, 1], [], []>} : vector<4x4xf32>, vector<4x256xf32>, vector<4x256xf32> -> vector<4x256xf32>
    %154 = arith.addf %149, %153 : vector<4x256xf32>
    %c0_121 = arith.constant 0 : index
    %c82 = arith.constant 82 : index
    %155 = vector.load %arg10[%c0_121, %c82] : memref<4x416xf32, #tpu.memory_space<vmem>>, vector<4x256xf32>
    %cst_122 = arith.constant 0.000000e+00 : f32
    %156 = vector.shape_cast %116 : vector<1x256xi1> to vector<1x256xi1>
    %157 = vector.broadcast %156 : vector<1x256xi1> to vector<4x256xi1>
    %158 = vector.broadcast %cst_122 : f32 to vector<4x256xf32>
    %159 = arith.select %157, %158, %155 : vector<4x256xi1>, vector<4x256xf32>
    %c1_123 = arith.constant 1 : index
    %c5_124 = arith.constant 5 : index
    %c0_125 = arith.constant 0 : index
    %c0_126 = arith.constant 0 : index
    %160 = vector.load %arg5[%c1_123, %c5_124, %c0_125, %c0_126] : memref<4x9x4x4xf32, #tpu.memory_space<vmem>>, vector<1x1x4x4xf32>
    %161 = vector.shape_cast %160 : vector<1x1x4x4xf32> to vector<4x4xf32>
    %cst_127 = arith.constant dense<0.000000e+00> : vector<4x256xf32>
    %162 = tpu.matmul %161, %159, %cst_127 {dimension_numbers = #tpu.dot_dimension_numbers<[1], [0], [0], [1], [0, 0, 1, 1], [], []>} : vector<4x4xf32>, vector<4x256xf32>, vector<4x256xf32> -> vector<4x256xf32>
    %163 = arith.addf %154, %162 : vector<4x256xf32>
    %c0_128 = arith.constant 0 : index
    %c110 = arith.constant 110 : index
    %164 = vector.load %arg10[%c0_128, %c110] : memref<4x416xf32, #tpu.memory_space<vmem>>, vector<4x256xf32>
    %cst_129 = arith.constant 0.000000e+00 : f32
    %165 = vector.shape_cast %114 : vector<1x256xi1> to vector<1x256xi1>
    %166 = vector.broadcast %165 : vector<1x256xi1> to vector<4x256xi1>
    %167 = vector.broadcast %cst_129 : f32 to vector<4x256xf32>
    %168 = arith.select %166, %167, %164 : vector<4x256xi1>, vector<4x256xf32>
    %c1_130 = arith.constant 1 : index
    %c6_131 = arith.constant 6 : index
    %c0_132 = arith.constant 0 : index
    %c0_133 = arith.constant 0 : index
    %169 = vector.load %arg5[%c1_130, %c6_131, %c0_132, %c0_133] : memref<4x9x4x4xf32, #tpu.memory_space<vmem>>, vector<1x1x4x4xf32>
    %170 = vector.shape_cast %169 : vector<1x1x4x4xf32> to vector<4x4xf32>
    %cst_134 = arith.constant dense<0.000000e+00> : vector<4x256xf32>
    %171 = tpu.matmul %170, %168, %cst_134 {dimension_numbers = #tpu.dot_dimension_numbers<[1], [0], [0], [1], [0, 0, 1, 1], [], []>} : vector<4x4xf32>, vector<4x256xf32>, vector<4x256xf32> -> vector<4x256xf32>
    %172 = arith.addf %163, %171 : vector<4x256xf32>
    %c0_135 = arith.constant 0 : index
    %c112 = arith.constant 112 : index
    %173 = vector.load %arg10[%c0_135, %c112] : memref<4x416xf32, #tpu.memory_space<vmem>>, vector<4x256xf32>
    %c1_136 = arith.constant 1 : index
    %c7_137 = arith.constant 7 : index
    %c0_138 = arith.constant 0 : index
    %c0_139 = arith.constant 0 : index
    %174 = vector.load %arg5[%c1_136, %c7_137, %c0_138, %c0_139] : memref<4x9x4x4xf32, #tpu.memory_space<vmem>>, vector<1x1x4x4xf32>
    %175 = vector.shape_cast %174 : vector<1x1x4x4xf32> to vector<4x4xf32>
    %cst_140 = arith.constant dense<0.000000e+00> : vector<4x256xf32>
    %176 = tpu.matmul %175, %173, %cst_140 {dimension_numbers = #tpu.dot_dimension_numbers<[1], [0], [0], [1], [0, 0, 1, 1], [], []>} : vector<4x4xf32>, vector<4x256xf32>, vector<4x256xf32> -> vector<4x256xf32>
    %177 = arith.addf %172, %176 : vector<4x256xf32>
    %c0_141 = arith.constant 0 : index
    %c114 = arith.constant 114 : index
    %178 = vector.load %arg10[%c0_141, %c114] : memref<4x416xf32, #tpu.memory_space<vmem>>, vector<4x256xf32>
    %cst_142 = arith.constant 0.000000e+00 : f32
    %179 = vector.shape_cast %116 : vector<1x256xi1> to vector<1x256xi1>
    %180 = vector.broadcast %179 : vector<1x256xi1> to vector<4x256xi1>
    %181 = vector.broadcast %cst_142 : f32 to vector<4x256xf32>
    %182 = arith.select %180, %181, %178 : vector<4x256xi1>, vector<4x256xf32>
    %c1_143 = arith.constant 1 : index
    %c8_144 = arith.constant 8 : index
    %c0_145 = arith.constant 0 : index
    %c0_146 = arith.constant 0 : index
    %183 = vector.load %arg5[%c1_143, %c8_144, %c0_145, %c0_146] : memref<4x9x4x4xf32, #tpu.memory_space<vmem>>, vector<1x1x4x4xf32>
    %184 = vector.shape_cast %183 : vector<1x1x4x4xf32> to vector<4x4xf32>
    %cst_147 = arith.constant dense<0.000000e+00> : vector<4x256xf32>
    %185 = tpu.matmul %184, %182, %cst_147 {dimension_numbers = #tpu.dot_dimension_numbers<[1], [0], [0], [1], [0, 0, 1, 1], [], []>} : vector<4x4xf32>, vector<4x256xf32>, vector<4x256xf32> -> vector<4x256xf32>
    %186 = arith.addf %177, %185 : vector<4x256xf32>
    %c1_148 = arith.constant 1 : index
    %c0_149 = arith.constant 0 : index
    %c0_150 = arith.constant 0 : index
    %187 = vector.load %arg6[%c1_148, %c0_149, %c0_150] : memref<4x4x1xf32, #tpu.memory_space<vmem>>, vector<1x4x1xf32>
    %188 = vector.shape_cast %187 : vector<1x4x1xf32> to vector<4x1xf32>
    %189 = vector.broadcast %188 : vector<4x1xf32> to vector<4x256xf32>
    %190 = arith.addf %186, %189 : vector<4x256xf32>
    %cst_151 = arith.constant 0.000000e+00 : f32
    %191 = vector.broadcast %cst_151 : f32 to vector<4x256xf32>
    %192 = arith.maximumf %190, %191 : vector<4x256xf32>
    %c8_152 = arith.constant 8 : index
    %c0_153 = arith.constant 0 : index
    %193 = vector.load %arg7[%c8_152, %c0_153] : memref<20x1xf32, #tpu.memory_space<vmem>>, vector<4x1xf32>
    %194 = vector.broadcast %193 : vector<4x1xf32> to vector<4x256xf32>
    %195 = arith.mulf %192, %194 : vector<4x256xf32>
    %c8_154 = arith.constant 8 : index
    %c0_155 = arith.constant 0 : index
    %196 = vector.load %arg8[%c8_154, %c0_155] : memref<20x1xf32, #tpu.memory_space<vmem>>, vector<4x1xf32>
    %197 = vector.broadcast %196 : vector<4x1xf32> to vector<4x256xf32>
    %198 = arith.addf %195, %197 : vector<4x256xf32>
    %cst_156 = arith.constant 0.000000e+00 : f32
    %199 = vector.broadcast %cst_156 : f32 to vector<4x256xf32>
    %200 = arith.maximumf %198, %199 : vector<4x256xf32>
    %c0_157 = arith.constant 0 : index
    %c8_158 = arith.constant 8 : index
    %c0_159 = arith.constant 0 : index
    %201 = vector.load %arg9[%c0_157, %c8_158, %c0_159] : memref<1x20x256xf32, #tpu.memory_space<vmem>>, vector<1x4x256xf32>
    %202 = vector.shape_cast %201 : vector<1x4x256xf32> to vector<4x256xf32>
    %203 = vector.shape_cast %200 : vector<4x256xf32> to vector<1x4x256xf32>
    tpu.vector_store %arg9[%c0_157, %c8_158, %c0_159], %203 {strides = array<i32>} : memref<1x20x256xf32, #tpu.memory_space<vmem>>, vector<1x4x256xf32>,
    %c3_i32 = arith.constant 3 : i32
    %204 = vector.broadcast %c3_i32 : i32 to vector<1x256xi32>
    %205 = arith.cmpi slt, %21, %204 : vector<1x256xi32>
    %c13_i32 = arith.constant 13 : i32
    %206 = vector.broadcast %c13_i32 : i32 to vector<1x256xi32>
    %207 = arith.cmpi sge, %21, %206 : vector<1x256xi32>
    %cst_160 = arith.constant 0.000000e+00 : f32
    %208 = vector.broadcast %cst_160 : f32 to vector<4x256xf32>
    %c0_161 = arith.constant 0 : index
    %c29 = arith.constant 29 : index
    %209 = vector.load %arg10[%c0_161, %c29] : memref<4x416xf32, #tpu.memory_space<vmem>>, vector<4x256xf32>
    %cst_162 = arith.constant 0.000000e+00 : f32
    %210 = vector.shape_cast %205 : vector<1x256xi1> to vector<1x256xi1>
    %211 = vector.broadcast %210 : vector<1x256xi1> to vector<4x256xi1>
    %212 = vector.broadcast %cst_162 : f32 to vector<4x256xf32>
    %213 = arith.select %211, %212, %209 : vector<4x256xi1>, vector<4x256xf32>
    %c2_163 = arith.constant 2 : index
    %c0_164 = arith.constant 0 : index
    %c0_165 = arith.constant 0 : index
    %c0_166 = arith.constant 0 : index
    %214 = vector.load %arg5[%c2_163, %c0_164, %c0_165, %c0_166] : memref<4x9x4x4xf32, #tpu.memory_space<vmem>>, vector<1x1x4x4xf32>
    %215 = vector.shape_cast %214 : vector<1x1x4x4xf32> to vector<4x4xf32>
    %cst_167 = arith.constant dense<0.000000e+00> : vector<4x256xf32>
    %216 = tpu.matmul %215, %213, %cst_167 {dimension_numbers = #tpu.dot_dimension_numbers<[1], [0], [0], [1], [0, 0, 1, 1], [], []>} : vector<4x4xf32>, vector<4x256xf32>, vector<4x256xf32> -> vector<4x256xf32>
    %217 = arith.addf %208, %216 : vector<4x256xf32>
    %c0_168 = arith.constant 0 : index
    %c32 = arith.constant 32 : index
    %218 = vector.load %arg10[%c0_168, %c32] : memref<4x416xf32, #tpu.memory_space<vmem>>, vector<4x256xf32>
    %c2_169 = arith.constant 2 : index
    %c1_170 = arith.constant 1 : index
    %c0_171 = arith.constant 0 : index
    %c0_172 = arith.constant 0 : index
    %219 = vector.load %arg5[%c2_169, %c1_170, %c0_171, %c0_172] : memref<4x9x4x4xf32, #tpu.memory_space<vmem>>, vector<1x1x4x4xf32>
    %220 = vector.shape_cast %219 : vector<1x1x4x4xf32> to vector<4x4xf32>
    %cst_173 = arith.constant dense<0.000000e+00> : vector<4x256xf32>
    %221 = tpu.matmul %220, %218, %cst_173 {dimension_numbers = #tpu.dot_dimension_numbers<[1], [0], [0], [1], [0, 0, 1, 1], [], []>} : vector<4x4xf32>, vector<4x256xf32>, vector<4x256xf32> -> vector<4x256xf32>
    %222 = arith.addf %217, %221 : vector<4x256xf32>
    %c0_174 = arith.constant 0 : index
    %c35 = arith.constant 35 : index
    %223 = vector.load %arg10[%c0_174, %c35] : memref<4x416xf32, #tpu.memory_space<vmem>>, vector<4x256xf32>
    %cst_175 = arith.constant 0.000000e+00 : f32
    %224 = vector.shape_cast %207 : vector<1x256xi1> to vector<1x256xi1>
    %225 = vector.broadcast %224 : vector<1x256xi1> to vector<4x256xi1>
    %226 = vector.broadcast %cst_175 : f32 to vector<4x256xf32>
    %227 = arith.select %225, %226, %223 : vector<4x256xi1>, vector<4x256xf32>
    %c2_176 = arith.constant 2 : index
    %c2_177 = arith.constant 2 : index
    %c0_178 = arith.constant 0 : index
    %c0_179 = arith.constant 0 : index
    %228 = vector.load %arg5[%c2_176, %c2_177, %c0_178, %c0_179] : memref<4x9x4x4xf32, #tpu.memory_space<vmem>>, vector<1x1x4x4xf32>
    %229 = vector.shape_cast %228 : vector<1x1x4x4xf32> to vector<4x4xf32>
    %cst_180 = arith.constant dense<0.000000e+00> : vector<4x256xf32>
    %230 = tpu.matmul %229, %227, %cst_180 {dimension_numbers = #tpu.dot_dimension_numbers<[1], [0], [0], [1], [0, 0, 1, 1], [], []>} : vector<4x4xf32>, vector<4x256xf32>, vector<4x256xf32> -> vector<4x256xf32>
    %231 = arith.addf %222, %230 : vector<4x256xf32>
    %c0_181 = arith.constant 0 : index
    %c77 = arith.constant 77 : index
    %232 = vector.load %arg10[%c0_181, %c77] : memref<4x416xf32, #tpu.memory_space<vmem>>, vector<4x256xf32>
    %cst_182 = arith.constant 0.000000e+00 : f32
    %233 = vector.shape_cast %205 : vector<1x256xi1> to vector<1x256xi1>
    %234 = vector.broadcast %233 : vector<1x256xi1> to vector<4x256xi1>
    %235 = vector.broadcast %cst_182 : f32 to vector<4x256xf32>
    %236 = arith.select %234, %235, %232 : vector<4x256xi1>, vector<4x256xf32>
    %c2_183 = arith.constant 2 : index
    %c3_184 = arith.constant 3 : index
    %c0_185 = arith.constant 0 : index
    %c0_186 = arith.constant 0 : index
    %237 = vector.load %arg5[%c2_183, %c3_184, %c0_185, %c0_186] : memref<4x9x4x4xf32, #tpu.memory_space<vmem>>, vector<1x1x4x4xf32>
    %238 = vector.shape_cast %237 : vector<1x1x4x4xf32> to vector<4x4xf32>
    %cst_187 = arith.constant dense<0.000000e+00> : vector<4x256xf32>
    %239 = tpu.matmul %238, %236, %cst_187 {dimension_numbers = #tpu.dot_dimension_numbers<[1], [0], [0], [1], [0, 0, 1, 1], [], []>} : vector<4x4xf32>, vector<4x256xf32>, vector<4x256xf32> -> vector<4x256xf32>
    %240 = arith.addf %231, %239 : vector<4x256xf32>
    %c0_188 = arith.constant 0 : index
    %c80_189 = arith.constant 80 : index
    %241 = vector.load %arg10[%c0_188, %c80_189] : memref<4x416xf32, #tpu.memory_space<vmem>>, vector<4x256xf32>
    %c2_190 = arith.constant 2 : index
    %c4_191 = arith.constant 4 : index
    %c0_192 = arith.constant 0 : index
    %c0_193 = arith.constant 0 : index
    %242 = vector.load %arg5[%c2_190, %c4_191, %c0_192, %c0_193] : memref<4x9x4x4xf32, #tpu.memory_space<vmem>>, vector<1x1x4x4xf32>
    %243 = vector.shape_cast %242 : vector<1x1x4x4xf32> to vector<4x4xf32>
    %cst_194 = arith.constant dense<0.000000e+00> : vector<4x256xf32>
    %244 = tpu.matmul %243, %241, %cst_194 {dimension_numbers = #tpu.dot_dimension_numbers<[1], [0], [0], [1], [0, 0, 1, 1], [], []>} : vector<4x4xf32>, vector<4x256xf32>, vector<4x256xf32> -> vector<4x256xf32>
    %245 = arith.addf %240, %244 : vector<4x256xf32>
    %c0_195 = arith.constant 0 : index
    %c83 = arith.constant 83 : index
    %246 = vector.load %arg10[%c0_195, %c83] : memref<4x416xf32, #tpu.memory_space<vmem>>, vector<4x256xf32>
    %cst_196 = arith.constant 0.000000e+00 : f32
    %247 = vector.shape_cast %207 : vector<1x256xi1> to vector<1x256xi1>
    %248 = vector.broadcast %247 : vector<1x256xi1> to vector<4x256xi1>
    %249 = vector.broadcast %cst_196 : f32 to vector<4x256xf32>
    %250 = arith.select %248, %249, %246 : vector<4x256xi1>, vector<4x256xf32>
    %c2_197 = arith.constant 2 : index
    %c5_198 = arith.constant 5 : index
    %c0_199 = arith.constant 0 : index
    %c0_200 = arith.constant 0 : index
    %251 = vector.load %arg5[%c2_197, %c5_198, %c0_199, %c0_200] : memref<4x9x4x4xf32, #tpu.memory_space<vmem>>, vector<1x1x4x4xf32>
    %252 = vector.shape_cast %251 : vector<1x1x4x4xf32> to vector<4x4xf32>
    %cst_201 = arith.constant dense<0.000000e+00> : vector<4x256xf32>
    %253 = tpu.matmul %252, %250, %cst_201 {dimension_numbers = #tpu.dot_dimension_numbers<[1], [0], [0], [1], [0, 0, 1, 1], [], []>} : vector<4x4xf32>, vector<4x256xf32>, vector<4x256xf32> -> vector<4x256xf32>
    %254 = arith.addf %245, %253 : vector<4x256xf32>
    %c0_202 = arith.constant 0 : index
    %c125 = arith.constant 125 : index
    %255 = vector.load %arg10[%c0_202, %c125] : memref<4x416xf32, #tpu.memory_space<vmem>>, vector<4x256xf32>
    %cst_203 = arith.constant 0.000000e+00 : f32
    %256 = vector.shape_cast %205 : vector<1x256xi1> to vector<1x256xi1>
    %257 = vector.broadcast %256 : vector<1x256xi1> to vector<4x256xi1>
    %258 = vector.broadcast %cst_203 : f32 to vector<4x256xf32>
    %259 = arith.select %257, %258, %255 : vector<4x256xi1>, vector<4x256xf32>
    %c2_204 = arith.constant 2 : index
    %c6_205 = arith.constant 6 : index
    %c0_206 = arith.constant 0 : index
    %c0_207 = arith.constant 0 : index
    %260 = vector.load %arg5[%c2_204, %c6_205, %c0_206, %c0_207] : memref<4x9x4x4xf32, #tpu.memory_space<vmem>>, vector<1x1x4x4xf32>
    %261 = vector.shape_cast %260 : vector<1x1x4x4xf32> to vector<4x4xf32>
    %cst_208 = arith.constant dense<0.000000e+00> : vector<4x256xf32>
    %262 = tpu.matmul %261, %259, %cst_208 {dimension_numbers = #tpu.dot_dimension_numbers<[1], [0], [0], [1], [0, 0, 1, 1], [], []>} : vector<4x4xf32>, vector<4x256xf32>, vector<4x256xf32> -> vector<4x256xf32>
    %263 = arith.addf %254, %262 : vector<4x256xf32>
    %c0_209 = arith.constant 0 : index
    %c128 = arith.constant 128 : index
    %264 = vector.load %arg10[%c0_209, %c128] : memref<4x416xf32, #tpu.memory_space<vmem>>, vector<4x256xf32>
    %c2_210 = arith.constant 2 : index
    %c7_211 = arith.constant 7 : index
    %c0_212 = arith.constant 0 : index
    %c0_213 = arith.constant 0 : index
    %265 = vector.load %arg5[%c2_210, %c7_211, %c0_212, %c0_213] : memref<4x9x4x4xf32, #tpu.memory_space<vmem>>, vector<1x1x4x4xf32>
    %266 = vector.shape_cast %265 : vector<1x1x4x4xf32> to vector<4x4xf32>
    %cst_214 = arith.constant dense<0.000000e+00> : vector<4x256xf32>
    %267 = tpu.matmul %266, %264, %cst_214 {dimension_numbers = #tpu.dot_dimension_numbers<[1], [0], [0], [1], [0, 0, 1, 1], [], []>} : vector<4x4xf32>, vector<4x256xf32>, vector<4x256xf32> -> vector<4x256xf32>
    %268 = arith.addf %263, %267 : vector<4x256xf32>
    %c0_215 = arith.constant 0 : index
    %c131 = arith.constant 131 : index
    %269 = vector.load %arg10[%c0_215, %c131] : memref<4x416xf32, #tpu.memory_space<vmem>>, vector<4x256xf32>
    %cst_216 = arith.constant 0.000000e+00 : f32
    %270 = vector.shape_cast %207 : vector<1x256xi1> to vector<1x256xi1>
    %271 = vector.broadcast %270 : vector<1x256xi1> to vector<4x256xi1>
    %272 = vector.broadcast %cst_216 : f32 to vector<4x256xf32>
    %273 = arith.select %271, %272, %269 : vector<4x256xi1>, vector<4x256xf32>
    %c2_217 = arith.constant 2 : index
    %c8_218 = arith.constant 8 : index
    %c0_219 = arith.constant 0 : index
    %c0_220 = arith.constant 0 : index
    %274 = vector.load %arg5[%c2_217, %c8_218, %c0_219, %c0_220] : memref<4x9x4x4xf32, #tpu.memory_space<vmem>>, vector<1x1x4x4xf32>
    %275 = vector.shape_cast %274 : vector<1x1x4x4xf32> to vector<4x4xf32>
    %cst_221 = arith.constant dense<0.000000e+00> : vector<4x256xf32>
    %276 = tpu.matmul %275, %273, %cst_221 {dimension_numbers = #tpu.dot_dimension_numbers<[1], [0], [0], [1], [0, 0, 1, 1], [], []>} : vector<4x4xf32>, vector<4x256xf32>, vector<4x256xf32> -> vector<4x256xf32>
    %277 = arith.addf %268, %276 : vector<4x256xf32>
    %c2_222 = arith.constant 2 : index
    %c0_223 = arith.constant 0 : index
    %c0_224 = arith.constant 0 : index
    %278 = vector.load %arg6[%c2_222, %c0_223, %c0_224] : memref<4x4x1xf32, #tpu.memory_space<vmem>>, vector<1x4x1xf32>
    %279 = vector.shape_cast %278 : vector<1x4x1xf32> to vector<4x1xf32>
    %280 = vector.broadcast %279 : vector<4x1xf32> to vector<4x256xf32>
    %281 = arith.addf %277, %280 : vector<4x256xf32>
    %cst_225 = arith.constant 0.000000e+00 : f32
    %282 = vector.broadcast %cst_225 : f32 to vector<4x256xf32>
    %283 = arith.maximumf %281, %282 : vector<4x256xf32>
    %c12 = arith.constant 12 : index
    %c0_226 = arith.constant 0 : index
    %284 = vector.load %arg7[%c12, %c0_226] : memref<20x1xf32, #tpu.memory_space<vmem>>, vector<4x1xf32>
    %285 = vector.broadcast %284 : vector<4x1xf32> to vector<4x256xf32>
    %286 = arith.mulf %283, %285 : vector<4x256xf32>
    %c12_227 = arith.constant 12 : index
    %c0_228 = arith.constant 0 : index
    %287 = vector.load %arg8[%c12_227, %c0_228] : memref<20x1xf32, #tpu.memory_space<vmem>>, vector<4x1xf32>
    %288 = vector.broadcast %287 : vector<4x1xf32> to vector<4x256xf32>
    %289 = arith.addf %286, %288 : vector<4x256xf32>
    %cst_229 = arith.constant 0.000000e+00 : f32
    %290 = vector.broadcast %cst_229 : f32 to vector<4x256xf32>
    %291 = arith.maximumf %289, %290 : vector<4x256xf32>
    %c0_230 = arith.constant 0 : index
    %c12_231 = arith.constant 12 : index
    %c0_232 = arith.constant 0 : index
    %292 = vector.load %arg9[%c0_230, %c12_231, %c0_232] : memref<1x20x256xf32, #tpu.memory_space<vmem>>, vector<1x4x256xf32>
    %293 = vector.shape_cast %292 : vector<1x4x256xf32> to vector<4x256xf32>
    %294 = vector.shape_cast %291 : vector<4x256xf32> to vector<1x4x256xf32>
    tpu.vector_store %arg9[%c0_230, %c12_231, %c0_232], %294 {strides = array<i32>} : memref<1x20x256xf32, #tpu.memory_space<vmem>>, vector<1x4x256xf32>,
    %c4_i32 = arith.constant 4 : i32
    %295 = vector.broadcast %c4_i32 : i32 to vector<1x256xi32>
    %296 = arith.cmpi slt, %21, %295 : vector<1x256xi32>
    %c12_i32 = arith.constant 12 : i32
    %297 = vector.broadcast %c12_i32 : i32 to vector<1x256xi32>
    %298 = arith.cmpi sge, %21, %297 : vector<1x256xi32>
    %cst_233 = arith.constant 0.000000e+00 : f32
    %299 = vector.broadcast %cst_233 : f32 to vector<4x256xf32>
    %c0_234 = arith.constant 0 : index
    %c12_235 = arith.constant 12 : index
    %300 = vector.load %arg10[%c0_234, %c12_235] : memref<4x416xf32, #tpu.memory_space<vmem>>, vector<4x256xf32>
    %cst_236 = arith.constant 0.000000e+00 : f32
    %301 = vector.shape_cast %296 : vector<1x256xi1> to vector<1x256xi1>
    %302 = vector.broadcast %301 : vector<1x256xi1> to vector<4x256xi1>
    %303 = vector.broadcast %cst_236 : f32 to vector<4x256xf32>
    %304 = arith.select %302, %303, %300 : vector<4x256xi1>, vector<4x256xf32>
    %c3_237 = arith.constant 3 : index
    %c0_238 = arith.constant 0 : index
    %c0_239 = arith.constant 0 : index
    %c0_240 = arith.constant 0 : index
    %305 = vector.load %arg5[%c3_237, %c0_238, %c0_239, %c0_240] : memref<4x9x4x4xf32, #tpu.memory_space<vmem>>, vector<1x1x4x4xf32>
    %306 = vector.shape_cast %305 : vector<1x1x4x4xf32> to vector<4x4xf32>
    %cst_241 = arith.constant dense<0.000000e+00> : vector<4x256xf32>
    %307 = tpu.matmul %306, %304, %cst_241 {dimension_numbers = #tpu.dot_dimension_numbers<[1], [0], [0], [1], [0, 0, 1, 1], [], []>} : vector<4x4xf32>, vector<4x256xf32>, vector<4x256xf32> -> vector<4x256xf32>
    %308 = arith.addf %299, %307 : vector<4x256xf32>
    %c0_242 = arith.constant 0 : index
    %c16 = arith.constant 16 : index
    %309 = vector.load %arg10[%c0_242, %c16] : memref<4x416xf32, #tpu.memory_space<vmem>>, vector<4x256xf32>
    %c3_243 = arith.constant 3 : index
    %c1_244 = arith.constant 1 : index
    %c0_245 = arith.constant 0 : index
    %c0_246 = arith.constant 0 : index
    %310 = vector.load %arg5[%c3_243, %c1_244, %c0_245, %c0_246] : memref<4x9x4x4xf32, #tpu.memory_space<vmem>>, vector<1x1x4x4xf32>
    %311 = vector.shape_cast %310 : vector<1x1x4x4xf32> to vector<4x4xf32>
    %cst_247 = arith.constant dense<0.000000e+00> : vector<4x256xf32>
    %312 = tpu.matmul %311, %309, %cst_247 {dimension_numbers = #tpu.dot_dimension_numbers<[1], [0], [0], [1], [0, 0, 1, 1], [], []>} : vector<4x4xf32>, vector<4x256xf32>, vector<4x256xf32> -> vector<4x256xf32>
    %313 = arith.addf %308, %312 : vector<4x256xf32>
    %c0_248 = arith.constant 0 : index
    %c20 = arith.constant 20 : index
    %314 = vector.load %arg10[%c0_248, %c20] : memref<4x416xf32, #tpu.memory_space<vmem>>, vector<4x256xf32>
    %cst_249 = arith.constant 0.000000e+00 : f32
    %315 = vector.shape_cast %298 : vector<1x256xi1> to vector<1x256xi1>
    %316 = vector.broadcast %315 : vector<1x256xi1> to vector<4x256xi1>
    %317 = vector.broadcast %cst_249 : f32 to vector<4x256xf32>
    %318 = arith.select %316, %317, %314 : vector<4x256xi1>, vector<4x256xf32>
    %c3_250 = arith.constant 3 : index
    %c2_251 = arith.constant 2 : index
    %c0_252 = arith.constant 0 : index
    %c0_253 = arith.constant 0 : index
    %319 = vector.load %arg5[%c3_250, %c2_251, %c0_252, %c0_253] : memref<4x9x4x4xf32, #tpu.memory_space<vmem>>, vector<1x1x4x4xf32>
    %320 = vector.shape_cast %319 : vector<1x1x4x4xf32> to vector<4x4xf32>
    %cst_254 = arith.constant dense<0.000000e+00> : vector<4x256xf32>
    %321 = tpu.matmul %320, %318, %cst_254 {dimension_numbers = #tpu.dot_dimension_numbers<[1], [0], [0], [1], [0, 0, 1, 1], [], []>} : vector<4x4xf32>, vector<4x256xf32>, vector<4x256xf32> -> vector<4x256xf32>
    %322 = arith.addf %313, %321 : vector<4x256xf32>
    %c0_255 = arith.constant 0 : index
    %c76 = arith.constant 76 : index
    %323 = vector.load %arg10[%c0_255, %c76] : memref<4x416xf32, #tpu.memory_space<vmem>>, vector<4x256xf32>
    %cst_256 = arith.constant 0.000000e+00 : f32
    %324 = vector.shape_cast %296 : vector<1x256xi1> to vector<1x256xi1>
    %325 = vector.broadcast %324 : vector<1x256xi1> to vector<4x256xi1>
    %326 = vector.broadcast %cst_256 : f32 to vector<4x256xf32>
    %327 = arith.select %325, %326, %323 : vector<4x256xi1>, vector<4x256xf32>
    %c3_257 = arith.constant 3 : index
    %c3_258 = arith.constant 3 : index
    %c0_259 = arith.constant 0 : index
    %c0_260 = arith.constant 0 : index
    %328 = vector.load %arg5[%c3_257, %c3_258, %c0_259, %c0_260] : memref<4x9x4x4xf32, #tpu.memory_space<vmem>>, vector<1x1x4x4xf32>
    %329 = vector.shape_cast %328 : vector<1x1x4x4xf32> to vector<4x4xf32>
    %cst_261 = arith.constant dense<0.000000e+00> : vector<4x256xf32>
    %330 = tpu.matmul %329, %327, %cst_261 {dimension_numbers = #tpu.dot_dimension_numbers<[1], [0], [0], [1], [0, 0, 1, 1], [], []>} : vector<4x4xf32>, vector<4x256xf32>, vector<4x256xf32> -> vector<4x256xf32>
    %331 = arith.addf %322, %330 : vector<4x256xf32>
    %c0_262 = arith.constant 0 : index
    %c80_263 = arith.constant 80 : index
    %332 = vector.load %arg10[%c0_262, %c80_263] : memref<4x416xf32, #tpu.memory_space<vmem>>, vector<4x256xf32>
    %c3_264 = arith.constant 3 : index
    %c4_265 = arith.constant 4 : index
    %c0_266 = arith.constant 0 : index
    %c0_267 = arith.constant 0 : index
    %333 = vector.load %arg5[%c3_264, %c4_265, %c0_266, %c0_267] : memref<4x9x4x4xf32, #tpu.memory_space<vmem>>, vector<1x1x4x4xf32>
    %334 = vector.shape_cast %333 : vector<1x1x4x4xf32> to vector<4x4xf32>
    %cst_268 = arith.constant dense<0.000000e+00> : vector<4x256xf32>
    %335 = tpu.matmul %334, %332, %cst_268 {dimension_numbers = #tpu.dot_dimension_numbers<[1], [0], [0], [1], [0, 0, 1, 1], [], []>} : vector<4x4xf32>, vector<4x256xf32>, vector<4x256xf32> -> vector<4x256xf32>
    %336 = arith.addf %331, %335 : vector<4x256xf32>
    %c0_269 = arith.constant 0 : index
    %c84 = arith.constant 84 : index
    %337 = vector.load %arg10[%c0_269, %c84] : memref<4x416xf32, #tpu.memory_space<vmem>>, vector<4x256xf32>
    %cst_270 = arith.constant 0.000000e+00 : f32
    %338 = vector.shape_cast %298 : vector<1x256xi1> to vector<1x256xi1>
    %339 = vector.broadcast %338 : vector<1x256xi1> to vector<4x256xi1>
    %340 = vector.broadcast %cst_270 : f32 to vector<4x256xf32>
    %341 = arith.select %339, %340, %337 : vector<4x256xi1>, vector<4x256xf32>
    %c3_271 = arith.constant 3 : index
    %c5_272 = arith.constant 5 : index
    %c0_273 = arith.constant 0 : index
    %c0_274 = arith.constant 0 : index
    %342 = vector.load %arg5[%c3_271, %c5_272, %c0_273, %c0_274] : memref<4x9x4x4xf32, #tpu.memory_space<vmem>>, vector<1x1x4x4xf32>
    %343 = vector.shape_cast %342 : vector<1x1x4x4xf32> to vector<4x4xf32>
    %cst_275 = arith.constant dense<0.000000e+00> : vector<4x256xf32>
    %344 = tpu.matmul %343, %341, %cst_275 {dimension_numbers = #tpu.dot_dimension_numbers<[1], [0], [0], [1], [0, 0, 1, 1], [], []>} : vector<4x4xf32>, vector<4x256xf32>, vector<4x256xf32> -> vector<4x256xf32>
    %345 = arith.addf %336, %344 : vector<4x256xf32>
    %c0_276 = arith.constant 0 : index
    %c140 = arith.constant 140 : index
    %346 = vector.load %arg10[%c0_276, %c140] : memref<4x416xf32, #tpu.memory_space<vmem>>, vector<4x256xf32>
    %cst_277 = arith.constant 0.000000e+00 : f32
    %347 = vector.shape_cast %296 : vector<1x256xi1> to vector<1x256xi1>
    %348 = vector.broadcast %347 : vector<1x256xi1> to vector<4x256xi1>
    %349 = vector.broadcast %cst_277 : f32 to vector<4x256xf32>
    %350 = arith.select %348, %349, %346 : vector<4x256xi1>, vector<4x256xf32>
    %c3_278 = arith.constant 3 : index
    %c6_279 = arith.constant 6 : index
    %c0_280 = arith.constant 0 : index
    %c0_281 = arith.constant 0 : index
    %351 = vector.load %arg5[%c3_278, %c6_279, %c0_280, %c0_281] : memref<4x9x4x4xf32, #tpu.memory_space<vmem>>, vector<1x1x4x4xf32>
    %352 = vector.shape_cast %351 : vector<1x1x4x4xf32> to vector<4x4xf32>
    %cst_282 = arith.constant dense<0.000000e+00> : vector<4x256xf32>
    %353 = tpu.matmul %352, %350, %cst_282 {dimension_numbers = #tpu.dot_dimension_numbers<[1], [0], [0], [1], [0, 0, 1, 1], [], []>} : vector<4x4xf32>, vector<4x256xf32>, vector<4x256xf32> -> vector<4x256xf32>
    %354 = arith.addf %345, %353 : vector<4x256xf32>
    %c0_283 = arith.constant 0 : index
    %c144 = arith.constant 144 : index
    %355 = vector.load %arg10[%c0_283, %c144] : memref<4x416xf32, #tpu.memory_space<vmem>>, vector<4x256xf32>
    %c3_284 = arith.constant 3 : index
    %c7_285 = arith.constant 7 : index
    %c0_286 = arith.constant 0 : index
    %c0_287 = arith.constant 0 : index
    %356 = vector.load %arg5[%c3_284, %c7_285, %c0_286, %c0_287] : memref<4x9x4x4xf32, #tpu.memory_space<vmem>>, vector<1x1x4x4xf32>
    %357 = vector.shape_cast %356 : vector<1x1x4x4xf32> to vector<4x4xf32>
    %cst_288 = arith.constant dense<0.000000e+00> : vector<4x256xf32>
    %358 = tpu.matmul %357, %355, %cst_288 {dimension_numbers = #tpu.dot_dimension_numbers<[1], [0], [0], [1], [0, 0, 1, 1], [], []>} : vector<4x4xf32>, vector<4x256xf32>, vector<4x256xf32> -> vector<4x256xf32>
    %359 = arith.addf %354, %358 : vector<4x256xf32>
    %c0_289 = arith.constant 0 : index
    %c148 = arith.constant 148 : index
    %360 = vector.load %arg10[%c0_289, %c148] : memref<4x416xf32, #tpu.memory_space<vmem>>, vector<4x256xf32>
    %cst_290 = arith.constant 0.000000e+00 : f32
    %361 = vector.shape_cast %298 : vector<1x256xi1> to vector<1x256xi1>
    %362 = vector.broadcast %361 : vector<1x256xi1> to vector<4x256xi1>
    %363 = vector.broadcast %cst_290 : f32 to vector<4x256xf32>
    %364 = arith.select %362, %363, %360 : vector<4x256xi1>, vector<4x256xf32>
    %c3_291 = arith.constant 3 : index
    %c8_292 = arith.constant 8 : index
    %c0_293 = arith.constant 0 : index
    %c0_294 = arith.constant 0 : index
    %365 = vector.load %arg5[%c3_291, %c8_292, %c0_293, %c0_294] : memref<4x9x4x4xf32, #tpu.memory_space<vmem>>, vector<1x1x4x4xf32>
    %366 = vector.shape_cast %365 : vector<1x1x4x4xf32> to vector<4x4xf32>
    %cst_295 = arith.constant dense<0.000000e+00> : vector<4x256xf32>
    %367 = tpu.matmul %366, %364, %cst_295 {dimension_numbers = #tpu.dot_dimension_numbers<[1], [0], [0], [1], [0, 0, 1, 1], [], []>} : vector<4x4xf32>, vector<4x256xf32>, vector<4x256xf32> -> vector<4x256xf32>
    %368 = arith.addf %359, %367 : vector<4x256xf32>
    %c3_296 = arith.constant 3 : index
    %c0_297 = arith.constant 0 : index
    %c0_298 = arith.constant 0 : index
    %369 = vector.load %arg6[%c3_296, %c0_297, %c0_298] : memref<4x4x1xf32, #tpu.memory_space<vmem>>, vector<1x4x1xf32>
    %370 = vector.shape_cast %369 : vector<1x4x1xf32> to vector<4x1xf32>
    %371 = vector.broadcast %370 : vector<4x1xf32> to vector<4x256xf32>
    %372 = arith.addf %368, %371 : vector<4x256xf32>
    %cst_299 = arith.constant 0.000000e+00 : f32
    %373 = vector.broadcast %cst_299 : f32 to vector<4x256xf32>
    %374 = arith.maximumf %372, %373 : vector<4x256xf32>
    %c16_300 = arith.constant 16 : index
    %c0_301 = arith.constant 0 : index
    %375 = vector.load %arg7[%c16_300, %c0_301] : memref<20x1xf32, #tpu.memory_space<vmem>>, vector<4x1xf32>
    %376 = vector.broadcast %375 : vector<4x1xf32> to vector<4x256xf32>
    %377 = arith.mulf %374, %376 : vector<4x256xf32>
    %c16_302 = arith.constant 16 : index
    %c0_303 = arith.constant 0 : index
    %378 = vector.load %arg8[%c16_302, %c0_303] : memref<20x1xf32, #tpu.memory_space<vmem>>, vector<4x1xf32>
    %379 = vector.broadcast %378 : vector<4x1xf32> to vector<4x256xf32>
    %380 = arith.addf %377, %379 : vector<4x256xf32>
    %cst_304 = arith.constant 0.000000e+00 : f32
    %381 = vector.broadcast %cst_304 : f32 to vector<4x256xf32>
    %382 = arith.maximumf %380, %381 : vector<4x256xf32>
    %c0_305 = arith.constant 0 : index
    %c16_306 = arith.constant 16 : index
    %c0_307 = arith.constant 0 : index
    %383 = vector.load %arg9[%c0_305, %c16_306, %c0_307] : memref<1x20x256xf32, #tpu.memory_space<vmem>>, vector<1x4x256xf32>
    %384 = vector.shape_cast %383 : vector<1x4x256xf32> to vector<4x256xf32>
    %385 = vector.shape_cast %382 : vector<4x256xf32> to vector<1x4x256xf32>
    tpu.vector_store %arg9[%c0_305, %c16_306, %c0_307], %385 {strides = array<i32>} : memref<1x20x256xf32, #tpu.memory_space<vmem>>, vector<1x4x256xf32>,
    return
  }
  func.func @transform_0(%arg0: i32) -> (i32, i32, i32) {
    %c0_i32 = arith.constant 0 : i32
    %c0_i32_0 = arith.constant 0 : i32
    %c0_i32_1 = arith.constant 0 : i32
    return %arg0, %c0_i32, %c0_i32_0 : i32, i32, i32
  }
  func.func @transform_1(%arg0: i32) -> (i32, i32) {
    %c0_i32 = arith.constant 0 : i32
    %c0_i32_0 = arith.constant 0 : i32
    %c0_i32_1 = arith.constant 0 : i32
    return %c0_i32, %c0_i32_0 : i32, i32
  }
  func.func @transform_2(%arg0: i32) -> (i32, i32) {
    %c0_i32 = arith.constant 0 : i32
    %c0_i32_0 = arith.constant 0 : i32
    %c0_i32_1 = arith.constant 0 : i32
    return %c0_i32, %c0_i32_0 : i32, i32
  }
  func.func @transform_3(%arg0: i32) -> (i32, i32) {
    %c0_i32 = arith.constant 0 : i32
    %c0_i32_0 = arith.constant 0 : i32
    %c0_i32_1 = arith.constant 0 : i32
    return %c0_i32, %c0_i32_0 : i32, i32
  }
  func.func @transform_4(%arg0: i32) -> (i32, i32, i32, i32) {
    %c0_i32 = arith.constant 0 : i32
    %c0_i32_0 = arith.constant 0 : i32
    %c0_i32_1 = arith.constant 0 : i32
    %c0_i32_2 = arith.constant 0 : i32
    %c0_i32_3 = arith.constant 0 : i32
    return %c0_i32, %c0_i32_0, %c0_i32_1, %c0_i32_2 : i32, i32, i32, i32
  }
  func.func @transform_5(%arg0: i32) -> (i32, i32, i32) {
    %c0_i32 = arith.constant 0 : i32
    %c0_i32_0 = arith.constant 0 : i32
    %c0_i32_1 = arith.constant 0 : i32
    %c0_i32_2 = arith.constant 0 : i32
    return %c0_i32, %c0_i32_0, %c0_i32_1 : i32, i32, i32
  }
  func.func @transform_6(%arg0: i32) -> (i32, i32) {
    %c0_i32 = arith.constant 0 : i32
    %c0_i32_0 = arith.constant 0 : i32
    %c0_i32_1 = arith.constant 0 : i32
    return %c0_i32, %c0_i32_0 : i32, i32
  }
  func.func @transform_7(%arg0: i32) -> (i32, i32) {
    %c0_i32 = arith.constant 0 : i32
    %c0_i32_0 = arith.constant 0 : i32
    %c0_i32_1 = arith.constant 0 : i32
    return %c0_i32, %c0_i32_0 : i32, i32
  }
  func.func @transform_8(%arg0: i32) -> (i32, i32, i32) {
    %c0_i32 = arith.constant 0 : i32
    %c0_i32_0 = arith.constant 0 : i32
    %c0_i32_1 = arith.constant 0 : i32
    return %arg0, %c0_i32, %c0_i32_0 : i32, i32, i32
  }
}

</mosaic_0001>

<bundles_post_ra>
// kernel: tpu_custom_call.1
= control target key start
LH: loop header
LB: loop body
LE: loop exit
PB: predicated region body
PF: predicated region fallthrough
CT: control target
= control target key end

     0   :  { %s4621_s27 = smov 0   ;;  %s5553_s0 = inlined_call_operand.vmem [shape: f32[2,4,256], index: 0, kind: input, shape index: {}]   ;;  %s5554_s1 = inlined_call_operand.vmem [shape: s32[1,256], index: 1, kind: input, shape index: {}]   ;;  %s5555_s2 = inlined_call_operand.vmem [shape: f32[4,4], index: 2, kind: input, shape index: {}]   ;;  %s5556_s3 = inlined_call_operand.vmem [shape: f32[4,1], index: 3, kind: input, shape index: {}]   ;;  %s5557_s4 = inlined_call_operand.vmem [shape: f32[4,9,4,4], index: 4, kind: input, shape index: {}]   ;;  %s5558_s5 = inlined_call_operand.vmem [shape: f32[4,4,1], index: 5, kind: input, shape index: {}]   ;;  %s5559_s6 = inlined_call_operand.vmem [shape: f32[20,1], index: 6, kind: input, shape index: {}]   ;;  %s5560_s7 = inlined_call_operand.vmem [shape: f32[20,1], index: 7, kind: input, shape index: {}]   ;;  %s5561_s8 = inlined_call_operand.vmem [shape: f32[2,20,256], index: 8, kind: output, shape index: {}]  }
   0x1 LB: > { %s4268_s28 = sadd.s32 4294967295, %s4543_s27   ;;  %p4272_p0 = scmp.ge.s32.totalorder %s4543_s27, 1  ;;  %s4543_s27 = sphi %s4621_s27, %s18_s27  }
   0x2   : > { %p262_p1 = scmp.lt.s32.totalorder %s4543_s27, 3 }
   0x4   : > { %p263_p2 = pnand %p4272_p0, %p262_p1 }
   0x5   : > { %p296_p3 = scmp.lt.s32.totalorder (!%p263_p2), %s4268_s28, 1  ;;  %v4545_v0 = vmov (!%p263_p2), 0.0   ;;  %v308_v1 = vld [vmem:[%s5556_s3] sm:$0xf] (!%p263_p2)  ;;  %v4546_v2 = vmov (!%p263_p2), 0   ;;  %vm320_vm0 = vcmask (!%p263_p2), 1043456  }
   0x6   : > { %266 = sbr.rel (%p263_p2) target bundleno = 915 (0x393), region = 52  ;;  %389 = vmatprep.mubr.f32.mxu0 (!%p263_p2), %v4545_v0  ;;  %416 = vst [vmem:[#allocation2] sm:$0xff] (!%p263_p2), %v4545_v0  ;;  %551 = vmatprep.mubr.f32.mxu1 (!%p263_p2), %v4545_v0  ;;  %v307_v5 = vld [vmem:[%s5555_s2] sm:$0xf] (!%p263_p2)  ;;  %vm316_vm1 = vcmask (!%p263_p2), 31744   ;;  %vm417_vm2 = vcmask (!%p263_p2), 261124  }
   0x7   : > { %4532 = vset.pattern.permute.xlu0 (!%p263_p2), %v4546_v2  ;;  %4533 = vset.pattern.permute.xlu1 (!%p263_p2), %v4546_v2  ;;  %vm418_vm3 = vmor (!%p263_p2), %vm417_vm2, %vm320_vm0  ;;  %s4547_s15 = smov (!%p263_p2), 80   ;;  %vm430_vm4 = vcmask (!%p263_p2), 1044096   ;;  %vm431_vm5 = vcmask (!%p263_p2), 1047556   ;;  %vm426_vm6 = vcmask (!%p263_p2), 654336   ;;  %vm434_vm7 = vcmask (!%p263_p2), 650240   ;;  %s4548_s16 = smov (!%p263_p2), 64  }
   0x8   : > { %311 = vperm.xlu0 (!%p263_p2), %4532, %v308_v1   ;;  %419 = vst.msk [vmem:[#allocation2 + $0x8] sm:$0xff] (!%p263_p2), %vm418_vm3, %v4545_v0  ;;  %vm432_vm8 = vmor (!%p263_p2), %vm431_vm5, %vm430_vm4  ;;  %s4549_s17 = smov (!%p263_p2), 82   ;;  %s4550_s18 = smov (!%p263_p2), 65   ;;  %vm477_vm10 = vcmask (!%p263_p2), 523264   ;;  %vm461_vm13 = vcmask (!%p263_p2), 531456   ;;  %vm660_vm3 = vcmask (!%p263_p2), 515072  }
   0x9   : > { %s4551_s19 = smov (!%p263_p2), 78   ;;  %s4552_s20 = smov (!%p263_p2), 63   ;;  %vm1411_vm4 = vcmask (!%p263_p2), 670720  }
   0xa   : > { %s4553_s21 = smov (!%p263_p2), 50   ;;  %s4554_s22 = smov (!%p263_p2), 49  }
   0xb   : > { %s4555_s23 = smov (!%p263_p2), 48   ;;  %s4556_s24 = smov (!%p263_p2), 46  }
   0xc   : > { %s4557_s25 = smov (!%p263_p2), 47   ;;  %s4558_s26 = smov (!%p263_p2), 18  }
   0xd   : > { %s5595_s28 = smov (!%p296_p3, %s4268_s28), 1  ;;  %s4559_s29 = smov 33  }
   0xe   : > { %s4427_s9 = sshll.u32 %s5595_s28, 3  ;;  %s4560_s30 = smov 16  }
   0xf   : > { %s300_s12 = scalar_lea.vmem %s5553_s0, %s4427_s9  ;;  %s4561_s9 = smov 32  }
  0x10   : > { %v306_v3 = vld [vmem:[%s300_s12] sm:$0xff]  ;;  %s4562_s10 = smov 14   ;;  %s4563_s11 = smov 31  }
  0x11   : > { %v315_v4 = vcombine.high %v306_v3, %v306_v3  ;;  %s4564_s12 = smov 96   ;;  %s4565_s13 = smov 112  }
  0x12   : > { %s4566_s14 = smov 99  }
  0x13   : > { %4276 = vmatprep.subr.msk.mxu0 %vm320_vm0, %v315_v4 }
  0x14   : > { %4277 = vmatpush1.msk.msra.mxu0 %vm320_vm0, %v306_v3 }
  0x15   : > { %4278 = vmatmul.mubr.msk.f32.vlgmr.msra.gmra.mrb[0].mxu0 %vm316_vm1, %v307_v5 }
  0x16   : > { %1501 = vmatprep.mubr.f32.mxu0 %v4545_v0 }
  0x87   : > { %v312_v6 = vpop.permute.xlu0 %311 }
  0xe8   : > { %v391_v7 = vpop.f32.mrb[0].mxu0 }
  0xe9   : > { %v4652_v8 = vadd.f32 %v391_v7, %v312_v6  ;;  %v393_v9 = vpop.f32.mrb[1].mxu0 }
  0xea   : > { %v4654_v10 = vadd.f32 %v393_v9, %v312_v6 }
  0xec   : > { %v422_v11 = vcombine.low %v4652_v8, %v4654_v10 }
  0xee   : > { %423 = vrot.lane.b32.xlu0 %v422_v11, %s4547_s15 }
 0x160   : > { %v424_v12 = vpop.permute.xlu0 %423 }
 0x161   : > { %v425_v13 = vrot.slane %v424_v12, 4 }
 0x163   : > { %v427_v14 = vsel %vm426_vm6, %v425_v13, %v424_v12  ;;  %435 = vst.msk [vmem:[#allocation2 + $0x8] sm:$0xf] %vm434_vm7, %v425_v13  ;;  %v442_v13 = vlaneseq }
 0x164   : > { %433 = vst.msk [vmem:[#allocation2] sm:$0xff] %vm432_vm8, %v427_v14 }
 0x16a   : > { %v1390_v15 = vld [vmem:[#allocation2 + $0x8] sm:$0xf] }
 0x16b   : > { %v440_v16 = vld [vmem:[#allocation2 + $0x8] sm:$0xf]  ;;  %1426 = vrot.lane.b32.xlu0 %v1390_v15, %s4547_s15  ;;  %v4678_v31 = vld [vmem:[#allocation2] sm:$0xff] }
 0x16c   : > { %475 = vrot.lane.b32.xlu1 %v440_v16, %s4548_s16  ;;  %v1589_v17 = vld [vmem:[#allocation2 + $0x8] sm:$0xf]  ;;  %v4718_v32 = vcombine.high %v4678_v31, %v4678_v31 }
 0x16d   : > { %v639_v18 = vld [vmem:[#allocation2 + $0x8] sm:$0xf] }
 0x16e   : > { %v1702_v19 = vld [vmem:[#allocation2 + $0x8] sm:$0xf] }
 0x16f   : > { %1409 = vrot.lane.b32.xlu0 %v1390_v15, %s4549_s17  ;;  %v752_v20 = vld [vmem:[#allocation2 + $0x8] sm:$0xf] }
 0x170   : > { %459 = vrot.lane.b32.xlu1 %v440_v16, %s4550_s18  ;;  %v1804_v21 = vld [vmem:[#allocation2 + $0x8] sm:$0xf]  ;;  %v4877_v16 = vld [vmem:[%s5554_s1] sm:$0x3] }
 0x171   : > { %v854_v22 = vld [vmem:[#allocation2 + $0x8] sm:$0xf]  ;;  %vm437_vm9 = vcmp.lt.s32.totalorder %v4877_v16, 1  ;;  %vm438_vm11 = vcmp.ge.s32.totalorder %v4877_v16, 15  ;;  %vm1387_vm12 = vcmp.lt.s32.totalorder %v4877_v16, 2  ;;  %vm1388_vm2 = vcmp.ge.s32.totalorder %v4877_v16, 14 }
 0x172   : > { %v1899_v23 = vld [vmem:[#allocation2 + $0x8] sm:$0xf] }
 0x173   : > { %1608 = vrot.lane.b32.xlu0 %v1589_v17, %s4551_s19  ;;  %v950_v24 = vld [vmem:[#allocation2 + $0x8] sm:$0xf]  ;;  %v3886_v17 = vld [vmem:[#allocation2 + $0xc] sm:$0xf] }
 0x174   : > { %658 = vrot.lane.b32.xlu1 %v639_v18, %s4552_s20  ;;  %v2001_v25 = vld [vmem:[#allocation2 + $0x8] sm:$0xf]  ;;  %v443_v18 = vshrl.u32 %v442_v13, 7 }
 0x175   : > { %v1052_v26 = vld [vmem:[#allocation2 + $0x8] sm:$0xf] }
 0x176   : > { %v2103_v27 = vld [vmem:[#allocation2 + $0x8] sm:$0xf] }
 0x177   : > { %1710 = vrot.lane.b32.xlu0 %v1702_v19, %s4553_s21  ;;  %v1154_v28 = vld [vmem:[#allocation2 + $0x8] sm:$0xf] }
 0x178   : > { %760 = vrot.lane.b32.xlu1 %v752_v20, %s4554_s22  ;;  %v2199_v29 = vld [vmem:[#allocation2 + $0x8] sm:$0xf] }
 0x179   : > { %v1250_v30 = vld [vmem:[#allocation2 + $0x8] sm:$0xf] }
 0x17a   : > { %v3274_v33 = vld [vmem:[#allocation2 + $0x8] sm:$0xf] }
 0x17b   : > { %1814 = vrot.lane.b32.xlu0 %v1804_v21, %s4555_s23  ;;  %v2334_v34 = vld [vmem:[#allocation2 + $0x8] sm:$0xf] }
 0x17c   : > { %864 = vrot.lane.b32.xlu1 %v854_v22, %s4555_s23  ;;  %v3474_v35 = vld [vmem:[#allocation2 + $0x8] sm:$0xf]  ;;  %v4885_v22 = vsub.s32 0, %v443_v18 }
 0x17d   : > { %v2534_v36 = vld [vmem:[#allocation2 + $0x8] sm:$0xf] }
 0x17e   : > { %v3587_v45 = vld [vmem:[#allocation2 + $0x8] sm:$0xf] }
 0x17f   : > { %1907 = vrot.lane.b32.xlu0 %v1899_v23, %s4556_s24  ;;  %v2647_v46 = vld [vmem:[#allocation2 + $0x8] sm:$0xf]  ;;  %v4887_v23 = vsub.s32 1, %v443_v18 }
 0x180   : > { %958 = vrot.lane.b32.xlu1 %v950_v24, %s4557_s25  ;;  %v3689_v57 = vld [vmem:[#allocation2 + $0x8] sm:$0xf] }
 0x181   : > { %v2749_v58 = vld [vmem:[#allocation2 + $0x8] sm:$0xf] }
 0x182   : > { %v3784_v5 = vld [vmem:[#allocation2 + $0x8] sm:$0xf] }
 0x183   : > { %2009 = vrot.lane.b32.xlu0 %v2001_v25, %s4558_s26  ;;  %v2844_v6 = vld [vmem:[#allocation2 + $0x8] sm:$0xf] }
 0x184   : > { %1060 = vrot.lane.b32.xlu1 %v1052_v26, %s4559_s29  ;;  %v2946_v21 = vld [vmem:[#allocation2 + $0x8] sm:$0xf]  ;;  %v441_v26 = vsel %vm437_vm9, 1, %v4546_v2  ;;  %vm762_vm9 = vcmask 400384  }
 0x187   : > { %2113 = vrot.lane.b32.xlu0 %v2103_v27, %s4560_s30  ;;  %v445_v27 = vrot.slane %v441_v26, %v4885_v22 }
 0x188   : > { %1164 = vrot.lane.b32.xlu1 %v1154_v28, %s4561_s9  ;;  %v449_v28 = vrot.slane %v441_v26, %v4887_v23 }
 0x189   : > { %vm4914_vm14 = vcmp.eq.s32.totalorder %v445_v27, 1 }
 0x18a   : > { %vm4918_vm15 = vcmp.eq.s32.totalorder %v449_v28, 1 }
 0x18b   : > { %2207 = vrot.lane.b32.xlu0 %v2199_v29, %s4562_s10 }
 0x18c   : > { %1258 = vrot.lane.b32.xlu1 %v1250_v30, %s4563_s11 }
 0x18f   : > { %471 = vrot.lane.b32.xlu0 %v4678_v31, %s4548_s16 }
 0x190   : > { %1422 = vrot.lane.b32.xlu1 %v4678_v31, %s4547_s15 }
 0x193   : > { %455 = vrot.lane.b32.xlu0 %v4678_v31, %s4550_s18 }
 0x194   : > { %1405 = vrot.lane.b32.xlu1 %v4678_v31, %s4549_s17 }
 0x197   : > { %654 = vrot.lane.b32.xlu0 %v4678_v31, %s4552_s20 }
 0x198   : > { %1604 = vrot.lane.b32.xlu1 %v4678_v31, %s4551_s19 }
 0x19b   : > { %756 = vrot.lane.b32.xlu0 %v4678_v31, %s4554_s22 }
 0x19c   : > { %1706 = vrot.lane.b32.xlu1 %v4678_v31, %s4553_s21 }
 0x19f   : > { %860 = vrot.lane.b32.xlu0 %v4678_v31, %s4555_s23 }
 0x1a0   : > { %1810 = vrot.lane.b32.xlu1 %v4678_v31, %s4555_s23 }
 0x1a3   : > { %954 = vrot.lane.b32.xlu0 %v4678_v31, %s4557_s25 }
 0x1a4   : > { %1903 = vrot.lane.b32.xlu1 %v4678_v31, %s4556_s24 }
 0x1a7   : > { %1056 = vrot.lane.b32.xlu0 %v4678_v31, %s4559_s29 }
 0x1a8   : > { %2005 = vrot.lane.b32.xlu1 %v4678_v31, %s4558_s26 }
 0x1ab   : > { %1160 = vrot.lane.b32.xlu0 %v4678_v31, %s4561_s9 }
 0x1ac   : > { %2109 = vrot.lane.b32.xlu1 %v4678_v31, %s4560_s30 }
 0x1af   : > { %1254 = vrot.lane.b32.xlu0 %v4678_v31, %s4563_s11 }
 0x1b0   : > { %2203 = vrot.lane.b32.xlu1 %v4678_v31, %s4562_s10 }
 0x1b3   : > { %2366 = vrot.lane.b32.xlu0 %v4678_v31, %s4564_s12 }
 0x1b4   : > { %473 = vrot.lane.b32.xlu1 %v4718_v32, %s4548_s16  ;;  %s4568_s16 = smov 93  }
 0x1b7   : > { %457 = vrot.lane.b32.xlu0 %v4718_v32, %s4550_s18  ;;  %s4570_s18 = smov 51  }
 0x1b8   : > { %1424 = vrot.lane.b32.xlu1 %v4718_v32, %s4547_s15  ;;  %s4567_s15 = smov 116  }
 0x1bb   : > { %3310 = vrot.lane.b32.xlu0 %v3274_v33, %s4565_s13 }
 0x1bc   : > { %2370 = vrot.lane.b32.xlu1 %v2334_v34, %s4564_s12 }
 0x1bf   : > { %656 = vrot.lane.b32.xlu0 %v4718_v32, %s4552_s20  ;;  %s4572_s20 = smov 45  }
 0x1c0   : > { %1407 = vrot.lane.b32.xlu1 %v4718_v32, %s4549_s17  ;;  %s4569_s17 = smov 108  }
 0x1c3   : > { %2349 = vrot.lane.b32.xlu0 %v4678_v31, %s4566_s14 }
 0x1c4   : > { %3306 = vrot.lane.b32.xlu1 %v4678_v31, %s4565_s13 }
 0x1c7   : > { %758 = vrot.lane.b32.xlu0 %v4718_v32, %s4554_s22  ;;  %s4574_s22 = smov 3  }
 0x1c8   : > { %1606 = vrot.lane.b32.xlu1 %v4718_v32, %s4551_s19  ;;  %s4571_s19 = smov 52  }
 0x1cb   : > { %3293 = vrot.lane.b32.xlu0 %v3274_v33, %s4567_s15 }
 0x1cc   : > { %2353 = vrot.lane.b32.xlu1 %v2334_v34, %s4566_s14 }
 0x1cf   : > { %862 = vrot.lane.b32.xlu0 %v4718_v32, %s4555_s23 }
 0x1d0   : > { %1708 = vrot.lane.b32.xlu1 %v4718_v32, %s4553_s21  ;;  %s4573_s21 = smov 44  }
 0x1d3   : > { %2549 = vrot.lane.b32.xlu0 %v4678_v31, %s4568_s16 }
 0x1d4   : > { %3289 = vrot.lane.b32.xlu1 %v4678_v31, %s4567_s15 }
 0x1d7   : > { %956 = vrot.lane.b32.xlu0 %v4718_v32, %s4557_s25 }
 0x1d8   : > { %1812 = vrot.lane.b32.xlu1 %v4718_v32, %s4555_s23 }
 0x1db   : > { %3493 = vrot.lane.b32.xlu0 %v3474_v35, %s4569_s17 }
 0x1dc   : > { %2553 = vrot.lane.b32.xlu1 %v2534_v36, %s4568_s16  ;;  %v4302_v36 = vld [vmem:[%s5557_s4 + $0x18] sm:$0xf] }
 0x1dd   : > { %v4758_v37 = vpop.permute.xlu0 %1426 }
 0x1de   : > { %v4760_v38 = vpop.permute.xlu1 %475 }
 0x1df   : > { %1058 = vrot.lane.b32.xlu0 %v4718_v32, %s4559_s29  ;;  %s4575_s29 = smov 125  }
 0x1e0   : > { %1905 = vrot.lane.b32.xlu1 %v4718_v32, %s4556_s24 }
 0x1e1   : > { %v4766_v39 = vpop.permute.xlu0 %1409 }
 0x1e2   : > { %v4768_v40 = vpop.permute.xlu1 %459 }
 0x1e3   : > { %2651 = vrot.lane.b32.xlu0 %v4678_v31, %s4570_s18 }
 0x1e4   : > { %3489 = vrot.lane.b32.xlu1 %v4678_v31, %s4569_s17 }
 0x1e5   : > { %v4774_v41 = vpop.permute.xlu0 %1608 }
 0x1e6   : > { %v4776_v42 = vpop.permute.xlu1 %658 }
 0x1e7   : > { %1162 = vrot.lane.b32.xlu0 %v4718_v32, %s4561_s9 }
 0x1e8   : > { %2007 = vrot.lane.b32.xlu1 %v4718_v32, %s4558_s26  ;;  %s4492_s26 = smul.u32 48, %s5595_s28 }
 0x1e9   : > { %v4782_v43 = vpop.permute.xlu0 %1710 }
 0x1ea   : > { %v4784_v44 = vpop.permute.xlu1 %760  ;;  %s5536_s9 = scalar_lea.vmem %s5561_s8, %s4492_s26 }
 0x1eb   : > { %3595 = vrot.lane.b32.xlu0 %v3587_v45, %s4571_s19  ;;  %v640_v45 = vsel %vm438_vm11, 1, %v4546_v2 }
 0x1ec   : > { %2655 = vrot.lane.b32.xlu1 %v2647_v46, %s4570_s18 }
 0x1ed   : > { %v4788_v47 = vpop.permute.xlu0 %1814 }
 0x1ee   : > { %v4790_v48 = vpop.permute.xlu1 %864 }
 0x1ef   : > { %1256 = vrot.lane.b32.xlu0 %v4718_v32, %s4563_s11 }
 0x1f0   : > { %2111 = vrot.lane.b32.xlu1 %v4718_v32, %s4560_s30 }
 0x1f1   : > { %v4796_v49 = vpop.permute.xlu0 %1907 }
 0x1f2   : > { %v4798_v50 = vpop.permute.xlu1 %958 }
 0x1f3   : > { %2368 = vrot.lane.b32.xlu0 %v4718_v32, %s4564_s12 }
 0x1f4   : > { %3591 = vrot.lane.b32.xlu1 %v4678_v31, %s4571_s19 }
 0x1f5   : > { %v4804_v51 = vpop.permute.xlu0 %2009 }
 0x1f6   : > { %v4806_v52 = vpop.permute.xlu1 %1060 }
 0x1f7   : > { %2755 = vrot.lane.b32.xlu0 %v4678_v31, %s4555_s23 }
 0x1f8   : > { %2205 = vrot.lane.b32.xlu1 %v4718_v32, %s4562_s10 }
 0x1f9   : > { %v4812_v53 = vpop.permute.xlu0 %2113 }
 0x1fa   : > { %v4814_v54 = vpop.permute.xlu1 %1164 }
 0x1fb   : > { %2351 = vrot.lane.b32.xlu0 %v4718_v32, %s4566_s14 }
 0x1fc   : > { %3308 = vrot.lane.b32.xlu1 %v4718_v32, %s4565_s13 }
 0x1fd   : > { %v4820_v55 = vpop.permute.xlu0 %2207 }
 0x1fe   : > { %v4822_v56 = vpop.permute.xlu1 %1258 }
 0x1ff   : > { %3699 = vrot.lane.b32.xlu0 %v3689_v57, %s4555_s23 }
 0x200   : > { %2759 = vrot.lane.b32.xlu1 %v2749_v58, %s4555_s23 }
 0x201   : > { %v472_v60 = vpop.permute.xlu0 %471 }
 0x202   : > { %v4826_v59 = vpop.permute.xlu1 %1422 }
 0x203   : > { %2551 = vrot.lane.b32.xlu0 %v4718_v32, %s4568_s16 }
 0x204   : > { %3291 = vrot.lane.b32.xlu1 %v4718_v32, %s4567_s15 }
 0x205   : > { %v4834_v62 = vpop.permute.xlu0 %455 }
 0x206   : > { %v4832_v61 = vpop.permute.xlu1 %1405 }
 0x207   : > { %2848 = vrot.lane.b32.xlu0 %v4678_v31, %s4572_s20 }
 0x208   : > { %3695 = vrot.lane.b32.xlu1 %v4678_v31, %s4555_s23 }
 0x209   : > { %v4841_v1 = vpop.permute.xlu0 %654 }
 0x20a   : > { %v4839_v63 = vpop.permute.xlu1 %1604 }
 0x20b   : > { %2653 = vrot.lane.b32.xlu0 %v4718_v32, %s4570_s18 }
 0x20c   : > { %3491 = vrot.lane.b32.xlu1 %v4718_v32, %s4569_s17 }
 0x20d   : > { %v4849_v4 = vpop.permute.xlu0 %756 }
 0x20e   : > { %v4847_v3 = vpop.permute.xlu1 %1706 }
 0x20f   : > { %3792 = vrot.lane.b32.xlu0 %v3784_v5, %s4573_s21 }
 0x210   : > { %2852 = vrot.lane.b32.xlu1 %v2844_v6, %s4572_s20 }
 0x211   : > { %v4854_v9 = vpop.permute.xlu0 %860 }
 0x212   : > { %v4852_v7 = vpop.permute.xlu1 %1810 }
 0x213   : > { %2757 = vrot.lane.b32.xlu0 %v4718_v32, %s4555_s23 }
 0x214   : > { %3593 = vrot.lane.b32.xlu1 %v4718_v32, %s4571_s19 }
 0x215   : > { %v4862_v12 = vpop.permute.xlu0 %954 }
 0x216   : > { %v4860_v11 = vpop.permute.xlu1 %1903 }
 0x217   : > { %2950 = vrot.lane.b32.xlu0 %v4678_v31, %s4574_s22 }
 0x218   : > { %3788 = vrot.lane.b32.xlu1 %v4678_v31, %s4573_s21  ;;  %v4902_v31 = vld [vmem:[#allocation2 + $0x4] sm:$0xff] }
 0x219   : > { %v4869_v15 = vpop.permute.xlu0 %1056  ;;  %v4925_v46 = vcombine.high %v4902_v31, %v4902_v31 }
 0x21a   : > { %v4867_v14 = vpop.permute.xlu1 %2005 }
 0x21b   : > { %2850 = vrot.lane.b32.xlu0 %v4718_v32, %s4572_s20 }
 0x21c   : > { %3697 = vrot.lane.b32.xlu1 %v4718_v32, %s4555_s23 }
 0x21d   : > { %v4881_v20 = vpop.permute.xlu0 %1160 }
 0x21e   : > { %v4879_v19 = vpop.permute.xlu1 %2109 }
 0x21f   : > { %3894 = vrot.lane.b32.xlu0 %v3886_v17, %s4567_s15 }
 0x220   : > { %2954 = vrot.lane.b32.xlu1 %v2946_v21, %s4574_s22 }
 0x221   : > { %v4891_v25 = vpop.permute.xlu0 %1254 }
 0x222   : > { %v4889_v24 = vpop.permute.xlu1 %2203 }
 0x223   : > { %2952 = vrot.lane.b32.xlu0 %v4718_v32, %s4574_s22 }
 0x224   : > { %3790 = vrot.lane.b32.xlu1 %v4718_v32, %s4573_s21  ;;  %v4279_v32 = vld [vmem:[%s5557_s4 + $0x4] sm:$0xf] }
 0x225   : > { %v4899_v29 = vpop.permute.xlu0 %2366 }
 0x226   : > { %v474_v30 = vpop.permute.xlu1 %473 }
 0x227   : > { %v479_v33 = vsel %vm477_vm10, %v474_v30, %v4760_v38  ;;  %v478_v34 = vsel %vm477_vm10, %v472_v60, %v474_v30  ;;  %3993 = vrot.lane.b32.xlu0 %v4902_v31, %s4565_s13  ;;  %v3133_v38 = vld [vmem:[#allocation2 + $0xc] sm:$0xf]  ;;  %v1391_v60 = vsel %vm1387_vm12, 1, %v4546_v2  ;;  %vm1610_vm10 = vcmask 637952  }
 0x228   : > { %3890 = vrot.lane.b32.xlu1 %v4902_v31, %s4567_s15  ;;  %4280 = vmatprep.subr.msk.mxu1 %vm320_vm0, %v479_v33  ;;  %v1395_v26 = vrot.slane %v1391_v60, %v4885_v22  ;;  %v1399_v27 = vrot.slane %v1391_v60, %v4887_v23  ;;  %v468_v33 = vld [vmem:[%s5557_s4] sm:$0xf]  ;;  %v1590_v60 = vsel %vm1388_vm2, 1, %v4546_v2  ;;  %vm1712_vm2 = vcmask 408576  }
 0x229   : > { %4281 = vmatpush1.msk.msra.mxu1 %vm320_vm0, %v478_v34  ;;  %v458_v57 = vpop.permute.xlu0 %457 }
 0x22a   : > { %v1425_v58 = vpop.permute.xlu1 %1424  ;;  %v462_v5 = vsel %vm461_vm13, %v4834_v62, %v458_v57  ;;  %v463_v6 = vsel %vm461_vm13, %v458_v57, %v4768_v40  ;;  %4282 = vmatmul.mubr.msk.f32.vlgmr.msra.gmra.mrb[0].mxu1 %vm316_vm1, %v4279_v32  ;;  %v4315_v40 = vld [vmem:[%s5557_s4 + $0x28] sm:$0xf]  ;;  %v648_v62 = vrot.slane %v640_v45, %v4887_v23  ;;  %vm4975_vm7 = vcmp.eq.s32.totalorder %v1395_v26, 1  ;;  %v4310_v32 = vld [vmem:[%s5557_s4 + $0x20] sm:$0xf] }
 0x22b   : > { %v1428_v13 = vsel %vm426_vm6, %v4826_v59, %v1425_v58  ;;  %v1429_v17 = vsel %vm426_vm6, %v1425_v58, %v4758_v37  ;;  %v466_v18 = vsel %vm4914_vm14, 0.0, %v462_v5  ;;  %v467_v21 = vsel %vm4918_vm15, 0.0, %v463_v6  ;;  %3141 = vrot.lane.b32.xlu0 %v3133_v38, %s4575_s29  ;;  %v3987_v37 = vld [vmem:[#allocation2 + $0xc] sm:$0xf]  ;;  %631 = vmatprep.mubr.f32.mxu1 %v4545_v0  ;;  %v4346_v26 = vld [vmem:[%s5557_s4 + $0x44] sm:$0xf] }
 0x22c   : > { %3892 = vrot.lane.b32.xlu1 %v4925_v46, %s4567_s15  ;;  %v644_v59 = vrot.slane %v640_v45, %v4885_v22  ;;  %4316 = vmatprep.subr.msk.mxu0 %vm320_vm0, %v1429_v17  ;;  %vm4971_vm6 = vcmp.eq.s32.totalorder %v648_v62, 1  ;;  %vm4979_vm8 = vcmp.eq.s32.totalorder %v1399_v27, 1  ;;  %v4286_v62 = vld [vmem:[%s5557_s4 + $0x8] sm:$0xf]  ;;  %vm866_vm13 = vcmask 392192  }
 0x22d   : > { %4283 = vmatprep.subr.msk.mxu1 %vm320_vm0, %v467_v21  ;;  %4317 = vmatpush1.msk.msra.mxu0 %vm320_vm0, %v1428_v13  ;;  %v4953_v28 = vpop.permute.xlu0 %3310 }
 0x22e   : > { %4284 = vmatpush1.msk.msra.mxu1 %vm320_vm0, %v466_v18  ;;  %v4956_v30 = vpop.permute.xlu1 %2370  ;;  %4318 = vmatmul.mubr.msk.f32.vlgmr.msra.gmra.mrb[2].mxu0 %vm316_vm1, %v4315_v40  ;;  %vm4967_vm5 = vcmp.eq.s32.totalorder %v644_v59, 1 }
 0x22f   : > { %3995 = vrot.lane.b32.xlu0 %v4925_v46, %s4565_s13  ;;  %1581 = vmatprep.mubr.f32.mxu0 %v4545_v0 }
 0x230   : > { %3997 = vrot.lane.b32.xlu1 %v3987_v37, %s4565_s13 }
 0x231   : > { %v657_v57 = vpop.permute.xlu0 %656 }
 0x232   : > { %v1408_v58 = vpop.permute.xlu1 %1407  ;;  %v661_v5 = vsel %vm660_vm3, %v4841_v1, %v657_v57  ;;  %v662_v6 = vsel %vm660_vm3, %v657_v57, %v4776_v42  ;;  %4285 = vmatmul.mubr.msk.f32.vlgmr.msra.gmra.mrb[0].mxu1 %vm316_vm1, %v468_v33  ;;  %v1594_v42 = vrot.slane %v1590_v60, %v4885_v22  ;;  %v4387_v33 = vld [vmem:[%s5558_s5 + $0x8] sm:$0xf]  ;;  %v4082_v57 = vld [vmem:[#allocation2 + $0xc] sm:$0xf]  ;;  %vm960_vm3 = vcmask 384000  }
 0x233   : > { %v1412_v13 = vsel %vm1411_vm4, %v4832_v61, %v1408_v58  ;;  %v1413_v17 = vsel %vm1411_vm4, %v1408_v58, %v4766_v39  ;;  %v665_v18 = vsel %vm4967_vm5, 0.0, %v661_v5  ;;  %v666_v21 = vsel %vm4971_vm6, 0.0, %v662_v6  ;;  %4088 = vrot.lane.b32.xlu0 %v4925_v46, %s4569_s17  ;;  %v4314_v39 = vld [vmem:[%s5557_s4 + $0x24] sm:$0xf]  ;;  %742 = vmatprep.mubr.f32.mxu1 %v4545_v0 }
 0x234   : > { %v1416_v40 = vsel %vm4975_vm7, 0.0, %v1412_v13  ;;  %v1417_v1 = vsel %vm4979_vm8, 0.0, %v1413_v17  ;;  %3137 = vrot.lane.b32.xlu1 %v4902_v31, %s4575_s29  ;;  %4287 = vmatprep.subr.msk.mxu1 %vm320_vm0, %v666_v21  ;;  %v1598_v61 = vrot.slane %v1590_v60, %v4887_v23  ;;  %vm5024_vm11 = vcmp.eq.s32.totalorder %v1594_v42, 1  ;;  %v4290_v42 = vld [vmem:[%s5557_s4 + $0xc] sm:$0xf] }
 0x235   : > { %4319 = vmatprep.subr.msk.mxu0 %vm320_vm0, %v1417_v1  ;;  %v5009_v59 = vpop.permute.xlu0 %2349  ;;  %4288 = vmatpush1.msk.msra.mxu1 %vm320_vm0, %v665_v18  ;;  %vm1062_vm4 = vcmask 269312  }
 0x236   : > { %4320 = vmatpush1.msk.msra.mxu0 %vm320_vm0, %v1416_v40  ;;  %v5013_v37 = vpop.permute.xlu1 %3306  ;;  %vm5028_vm12 = vcmp.eq.s32.totalorder %v1598_v61, 1  ;;  %v3245_v61 = vld [vmem:[%s5559_s6 + $0xc] sm:$0xf] }
 0x237   : > { %4321 = vmatmul.mubr.msk.f32.vlgmr.msra.gmra.mrb[2].mxu0 %vm316_vm1, %v4314_v39  ;;  %4086 = vrot.lane.b32.xlu0 %v4902_v31, %s4569_s17 }
 0x238   : > { %3139 = vrot.lane.b32.xlu1 %v4925_v46, %s4575_s29  ;;  %1692 = vmatprep.mubr.f32.mxu0 %v4545_v0 }
 0x239   : > { %v759_v58 = vpop.permute.xlu0 %758 }
 0x23a   : > { %v1607_v60 = vpop.permute.xlu1 %1606  ;;  %v763_v5 = vsel %vm762_vm9, %v4849_v4, %v759_v58  ;;  %v764_v6 = vsel %vm762_vm9, %v759_v58, %v4784_v44  ;;  %4289 = vmatmul.mubr.msk.f32.vlgmr.msra.gmra.mrb[0].mxu1 %vm316_vm1, %v4286_v62  ;;  %v4322_v44 = vld [vmem:[%s5557_s4 + $0x2c] sm:$0xf]  ;;  %v4350_v62 = vld [vmem:[%s5558_s5 + $0x4] sm:$0xf]  ;;  %vm1909_vm9 = vcmask 375808  }
 0x23b   : > { %v1611_v13 = vsel %vm1610_vm10, %v4839_v63, %v1607_v60  ;;  %v1612_v17 = vsel %vm1610_vm10, %v1607_v60, %v4774_v41  ;;  %v767_v18 = vsel %vm4914_vm14, 0.0, %v763_v5  ;;  %v768_v21 = vsel %vm4918_vm15, 0.0, %v764_v6  ;;  %3238 = vperm.xlu0 %4532, %v4387_v33   ;;  %v4424_v41 = vld [vmem:[%s5558_s5 + $0xc] sm:$0xf]  ;;  %v1351_v63 = vld [vmem:[%s5558_s5] sm:$0xf]  ;;  %844 = vmatprep.mubr.f32.mxu1 %v4545_v0 }
 0x23c   : > { %v1615_v40 = vsel %vm5024_vm11, 0.0, %v1611_v13  ;;  %v1616_v4 = vsel %vm5028_vm12, 0.0, %v1612_v17  ;;  %4090 = vrot.lane.b32.xlu1 %v4082_v57, %s4569_s17  ;;  %4291 = vmatprep.subr.msk.mxu1 %vm320_vm0, %v768_v21  ;;  %v4294_v21 = vld [vmem:[%s5557_s4 + $0x10] sm:$0xf]  ;;  %vm2331_vm10 = vcmp.lt.s32.totalorder %v4877_v16, 3 }
 0x23d   : > { %4323 = vmatprep.subr.msk.mxu0 %vm320_vm0, %v1616_v4  ;;  %v5061_v1 = vpop.permute.xlu0 %3293  ;;  %4292 = vmatpush1.msk.msra.mxu1 %vm320_vm0, %v767_v18  ;;  %v396_v4 = vld [vmem:[%s5559_s6] sm:$0xf] }
 0x23e   : > { %4324 = vmatpush1.msk.msra.mxu0 %vm320_vm0, %v1615_v40  ;;  %v5065_v39 = vpop.permute.xlu1 %2353  ;;  %v3253_v40 = vld [vmem:[%s5560_s7 + $0xc] sm:$0xf] }
 0x23f   : > { %4325 = vmatmul.mubr.msk.f32.vlgmr.msra.gmra.mrb[2].mxu0 %vm316_vm1, %v4322_v44  ;;  %4186 = vperm.xlu0 %4532, %v4424_v41  }
 0x240   : > { %1354 = vperm.xlu1 %4533, %v1351_v63   ;;  %1794 = vmatprep.mubr.f32.mxu0 %v4545_v0 }
 0x241   : > { %v863_v33 = vpop.permute.xlu0 %862 }
 0x242   : > { %v1709_v57 = vpop.permute.xlu1 %1708  ;;  %v867_v58 = vsel %vm866_vm13, %v4854_v9, %v863_v33  ;;  %v868_v60 = vsel %vm866_vm13, %v863_v33, %v4790_v48  ;;  %4293 = vmatmul.mubr.msk.f32.vlgmr.msra.gmra.mrb[0].mxu1 %vm316_vm1, %v4290_v42  ;;  %v4326_v9 = vld [vmem:[%s5557_s4 + $0x30] sm:$0xf]  ;;  %v1361_v48 = vld [vmem:[%s5559_s6 + $0x4] sm:$0xf] }
 0x243   : > { %v1713_v5 = vsel %vm1712_vm2, %v4847_v3, %v1709_v57  ;;  %v1714_v6 = vsel %vm1712_vm2, %v1709_v57, %v4782_v43  ;;  %3248 = vperm.xlu0 %4532, %v3245_v61   ;;  %4295 = vmatprep.subr.msk.mxu1 %vm320_vm0, %v868_v60  ;;  %v1369_v43 = vld [vmem:[%s5560_s7 + $0x4] sm:$0xf]  ;;  %v4298_v60 = vld [vmem:[%s5557_s4 + $0x14] sm:$0xf]  ;;  %vm2372_vm2 = vcmask 785408  }
 0x244   : > { %v1717_v13 = vsel %vm4975_vm7, 0.0, %v1713_v5  ;;  %v1718_v17 = vsel %vm4979_vm8, 0.0, %v1714_v6  ;;  %2304 = vperm.xlu1 %4533, %v4350_v62   ;;  %4296 = vmatpush1.msk.msra.mxu1 %vm320_vm0, %v867_v58  ;;  %v2311_v58 = vld [vmem:[%s5559_s6 + $0x8] sm:$0xf]  ;;  %v4201_v5 = vld [vmem:[%s5560_s7 + $0x10] sm:$0xf] }
 0x245   : > { %4327 = vmatprep.subr.msk.mxu0 %vm320_vm0, %v1718_v17  ;;  %v5102_v3 = vpop.permute.xlu0 %2549  ;;  %940 = vmatprep.mubr.f32.mxu1 %v4545_v0 }
 0x246   : > { %4328 = vmatpush1.msk.msra.mxu0 %vm320_vm0, %v1717_v13  ;;  %v5105_v18 = vpop.permute.xlu1 %3289 }
 0x247   : > { %4329 = vmatmul.mubr.msk.f32.vlgmr.msra.gmra.mrb[2].mxu0 %vm316_vm1, %v4326_v9  ;;  %1372 = vperm.xlu0 %4532, %v1369_v43  }
 0x248   : > { %1364 = vperm.xlu1 %4533, %v1361_v48   ;;  %1889 = vmatprep.mubr.f32.mxu0 %v4545_v0 }
 0x249   : > { %v957_v44 = vpop.permute.xlu0 %956 }
 0x24a   : > { %v1813_v41 = vpop.permute.xlu1 %1812  ;;  %v961_v63 = vsel %vm960_vm3, %v4862_v12, %v957_v44  ;;  %v962_v42 = vsel %vm960_vm3, %v957_v44, %v4798_v50  ;;  %4297 = vmatmul.mubr.msk.f32.vlgmr.msra.gmra.mrb[0].mxu1 %vm316_vm1, %v4294_v21  ;;  %v4330_v50 = vld [vmem:[%s5557_s4 + $0x34] sm:$0xf]  ;;  %v4334_v21 = vld [vmem:[%s5557_s4 + $0x38] sm:$0xf]  ;;  %vm3271_vm3 = vcmp.lt.s32.totalorder %v4877_v16, 4 }
 0x24b   : > { %v1816_v61 = vsel %vm866_vm13, %v4852_v7, %v1813_v41  ;;  %v1817_v62 = vsel %vm866_vm13, %v1813_v41, %v4788_v47  ;;  %v965_v33 = vsel %vm4967_vm5, 0.0, %v961_v63  ;;  %v966_v57 = vsel %vm4971_vm6, 0.0, %v962_v42  ;;  %3256 = vperm.xlu0 %4532, %v3253_v40   ;;  %v404_v47 = vld [vmem:[%s5560_s7] sm:$0xf]  ;;  %1042 = vmatprep.mubr.f32.mxu1 %v4545_v0 }
 0x24c   : > { %399 = vperm.xlu1 %4533, %v396_v4   ;;  %4331 = vmatprep.subr.msk.mxu0 %vm320_vm0, %v1817_v62 }
 0x24d   : > { %4299 = vmatprep.subr.msk.mxu1 %vm320_vm0, %v966_v57  ;;  %4332 = vmatpush1.msk.msra.mxu0 %vm320_vm0, %v1816_v61  ;;  %v5139_v7 = vpop.permute.xlu0 %3493 }
 0x24e   : > { %4300 = vmatpush1.msk.msra.mxu1 %vm320_vm0, %v965_v33  ;;  %v5142_v12 = vpop.permute.xlu1 %2553  ;;  %v2319_v33 = vld [vmem:[%s5560_s7 + $0x8] sm:$0xf] }
 0x24f   : > { %4333 = vmatmul.mubr.msk.f32.vlgmr.msra.gmra.mrb[2].mxu0 %vm316_vm1, %v4330_v50  ;;  %407 = vperm.xlu0 %4532, %v404_v47  }
 0x250   : > { %1991 = vmatprep.mubr.f32.mxu0 %v4545_v0  ;;  %2314 = vperm.xlu1 %4533, %v2311_v58  }
 0x251   : > { %v1059_v6 = vpop.permute.xlu0 %1058 }
 0x252   : > { %v1906_v13 = vpop.permute.xlu1 %1905  ;;  %v1063_v17 = vsel %vm1062_vm4, %v4869_v15, %v1059_v6  ;;  %v1064_v9 = vsel %vm1062_vm4, %v1059_v6, %v4806_v52  ;;  %4301 = vmatmul.mubr.msk.f32.vlgmr.msra.gmra.mrb[0].mxu1 %vm316_vm1, %v4298_v60  ;;  %vm2355_vm4 = vcmask 809984  }
 0x253   : > { %v1910_v43 = vsel %vm1909_vm9, %v4860_v11, %v1906_v13  ;;  %v1911_v48 = vsel %vm1909_vm9, %v1906_v13, %v4796_v49  ;;  %v1067_v40 = vsel %vm4914_vm14, 0.0, %v1063_v17  ;;  %v1068_v4 = vsel %vm4918_vm15, 0.0, %v1064_v9  ;;  %4204 = vperm.xlu0 %4532, %v4201_v5   ;;  %1144 = vmatprep.mubr.f32.mxu1 %v4545_v0  ;;  %v4193_v49 = vld [vmem:[%s5559_s6 + $0x10] sm:$0xf] }
 0x254   : > { %v1914_v15 = vsel %vm5024_vm11, 0.0, %v1910_v43  ;;  %v1915_v52 = vsel %vm5028_vm12, 0.0, %v1911_v48  ;;  %4303 = vmatprep.subr.msk.mxu1 %vm320_vm0, %v1068_v4  ;;  %4196 = vperm.xlu1 %4533, %v4193_v49   ;;  %vm1166_vm14 = vcmask 261120   ;;  %vm2011_vm15 = vcmask 146432  }
 0x255   : > { %4335 = vmatprep.subr.msk.mxu0 %vm320_vm0, %v1915_v52  ;;  %v5178_v11 = vpop.permute.xlu0 %2651  ;;  %4304 = vmatpush1.msk.msra.mxu1 %vm320_vm0, %v1067_v40  ;;  %vm3312_vm9 = vcmask 916480  }
 0x256   : > { %4336 = vmatpush1.msk.msra.mxu0 %vm320_vm0, %v1914_v15  ;;  %v5182_v35 = vpop.permute.xlu1 %3489 }
 0x257   : > { %4337 = vmatmul.mubr.msk.f32.vlgmr.msra.gmra.mrb[2].mxu0 %vm316_vm1, %v4334_v21 }
 0x258   : > { %2093 = vmatprep.mubr.f32.mxu0 %v4545_v0  ;;  %2322 = vperm.xlu1 %4533, %v2319_v33  }
 0x259   : > { %v1163_v44 = vpop.permute.xlu0 %1162 }
 0x25a   : > { %v2008_v41 = vpop.permute.xlu1 %2007  ;;  %v1167_v63 = vsel %vm1166_vm14, %v4881_v20, %v1163_v44  ;;  %v1168_v42 = vsel %vm1166_vm14, %v1163_v44, %v4814_v54  ;;  %4305 = vmatmul.mubr.msk.f32.vlgmr.msra.gmra.mrb[0].mxu1 %vm316_vm1, %v4302_v36  ;;  %v4338_v54 = vld [vmem:[%s5557_s4 + $0x3c] sm:$0xf]  ;;  %v3275_v36 = vsel %vm3271_vm3, 1, %v4546_v2  ;;  %vm3495_vm3 = vcmask 883712  }
 0x25b   : > { %v2012_v61 = vsel %vm2011_vm15, %v4867_v14, %v2008_v41  ;;  %v2013_v62 = vsel %vm2011_vm15, %v2008_v41, %v4804_v51  ;;  %4307 = vmatprep.subr.msk.mxu1 %vm320_vm0, %v1168_v42  ;;  %1240 = vmatprep.mubr.f32.mxu1 %v4545_v0  ;;  %v4306_v20 = vld [vmem:[%s5557_s4 + $0x1c] sm:$0xf]  ;;  %v3283_v33 = vrot.slane %v3275_v36, %v4887_v23 }
 0x25c   : > { %v2016_v57 = vsel %vm4975_vm7, 0.0, %v2012_v61  ;;  %v2017_v50 = vsel %vm4979_vm8, 0.0, %v2013_v62  ;;  %4308 = vmatpush1.msk.msra.mxu1 %vm320_vm0, %v1167_v63  ;;  %vm1260_vm7 = vcmask 252928   ;;  %vm2115_vm8 = vcmask 130048  }
 0x25d   : > { %4339 = vmatprep.subr.msk.mxu0 %vm320_vm0, %v2017_v50  ;;  %v5208_v51 = vpop.permute.xlu0 %3595 }
 0x25e   : > { %4340 = vmatpush1.msk.msra.mxu0 %vm320_vm0, %v2016_v57  ;;  %v5211_v14 = vpop.permute.xlu1 %2655 }
 0x25f   : > { %4341 = vmatmul.mubr.msk.f32.vlgmr.msra.gmra.mrb[2].mxu0 %vm316_vm1, %v4338_v54  ;;  %v4351_v54 = vld [vmem:[%s5557_s4 + $0x48] sm:$0xf] }
 0x260   : > { %2189 = vmatprep.mubr.f32.mxu0 %v4545_v0 }
 0x261   : > { %v1257_v38 = vpop.permute.xlu0 %1256 }
 0x262   : > { %v2112_v45 = vpop.permute.xlu1 %2111  ;;  %v1261_v47 = vsel %vm1260_vm7, %v4891_v25, %v1257_v38  ;;  %v1262_v58 = vsel %vm1260_vm7, %v1257_v38, %v4822_v56  ;;  %4309 = vmatmul.mubr.msk.f32.vlgmr.msra.gmra.mrb[0].mxu1 %vm316_vm1, %v4306_v20  ;;  %v4342_v25 = vld [vmem:[%s5557_s4 + $0x40] sm:$0xf]  ;;  %vm3295_vm7 = vcmask 949248  }
 0x263   : > { %v2116_v60 = vsel %vm2115_vm8, %v4879_v19, %v2112_v45  ;;  %v2117_v5 = vsel %vm2115_vm8, %v2112_v45, %v4812_v53  ;;  %v1265_v6 = vsel %vm4967_vm5, 0.0, %v1261_v47  ;;  %v1266_v13 = vsel %vm4971_vm6, 0.0, %v1262_v58  ;;  %1342 = vmatprep.mubr.f32.mxu1 %v4545_v0 }
 0x264   : > { %4343 = vmatprep.subr.msk.mxu0 %vm320_vm0, %v2117_v5  ;;  %4311 = vmatprep.subr.msk.mxu1 %vm320_vm0, %v1266_v13  ;;  %v2335_v19 = vsel %vm2331_vm10, 1, %v4546_v2  ;;  %vm2209_vm5 = vcmask 113664   ;;  %vm2332_vm6 = vcmp.ge.s32.totalorder %v4877_v16, 13 }
 0x265   : > { %4344 = vmatpush1.msk.msra.mxu0 %vm320_vm0, %v2116_v60  ;;  %v2369_v53 = vpop.permute.xlu0 %2368  ;;  %4312 = vmatpush1.msk.msra.mxu1 %vm320_vm0, %v1265_v6  ;;  %v2339_v17 = vrot.slane %v2335_v19, %v4885_v22  ;;  %v2343_v9 = vrot.slane %v2335_v19, %v4887_v23  ;;  %v2535_v27 = vsel %vm2332_vm6, 1, %v4546_v2  ;;  %vm2657_vm6 = vcmask 416768  }
 0x266   : > { %v5236_v56 = vpop.permute.xlu1 %3591  ;;  %v2374_v34 = vsel %vm2372_vm2, %v2369_v53, %v4956_v30  ;;  %v2373_v30 = vsel %vm2372_vm2, %v4899_v29, %v2369_v53  ;;  %v4352_v29 = vld [vmem:[%s5557_s4 + $0x4c] sm:$0xf] }
 0x267   : > { %4345 = vmatmul.mubr.msk.f32.vlgmr.msra.gmra.mrb[2].mxu0 %vm316_vm1, %v4342_v25  ;;  %4353 = vmatprep.subr.msk.mxu1 %vm320_vm0, %v2374_v34  ;;  %vm5270_vm14 = vcmp.eq.s32.totalorder %v2339_v17, 1  ;;  %vm5274_vm15 = vcmp.eq.s32.totalorder %v2343_v9, 1  ;;  %v4359_v17 = vld [vmem:[%s5557_s4 + $0x50] sm:$0xf] }
 0x268   : > { %2291 = vmatprep.mubr.f32.mxu0 %v4545_v0 }
 0x269   : > { %v5251_v43 = vpop.permute.xlu0 %2755 }
 0x26a   : > { %v2206_v48 = vpop.permute.xlu1 %2205  ;;  %4313 = vmatmul.mubr.msk.f32.vlgmr.msra.gmra.mrb[0].mxu1 %vm316_vm1, %v4310_v32 }
 0x26b   : > { %v2210_v21 = vsel %vm2209_vm5, %v4889_v24, %v2206_v48  ;;  %v2211_v40 = vsel %vm2209_vm5, %v2206_v48, %v4820_v55  ;;  %4354 = vmatpush1.msk.msra.mxu1 %vm320_vm0, %v2373_v30  ;;  %2446 = vmatprep.mubr.f32.mxu1 %v4545_v0  ;;  %vm5334_vm5 = vcmp.eq.s32.totalorder %v3283_v33, 1  ;;  %v4408_v55 = vld [vmem:[%s5557_s4 + $0x80] sm:$0xf] }
 0x26c   : > { %v2214_v4 = vsel %vm5024_vm11, 0.0, %v2210_v21  ;;  %v2215_v15 = vsel %vm5028_vm12, 0.0, %v2211_v40  ;;  %vm3272_vm11 = vcmp.ge.s32.totalorder %v4877_v16, 12  ;;  %vm2555_vm12 = vcmask 760832   ;;  %v4379_v16 = vld [vmem:[%s5557_s4 + $0x64] sm:$0xf] }
 0x26d   : > { %4347 = vmatprep.subr.msk.mxu0 %vm320_vm0, %v2215_v15  ;;  %v2352_v52 = vpop.permute.xlu0 %2351  ;;  %v3475_v60 = vsel %vm3272_vm11, 1, %v4546_v2 }
 0x26e   : > { %4348 = vmatpush1.msk.msra.mxu0 %vm320_vm0, %v2214_v4  ;;  %v3309_v49 = vpop.permute.xlu1 %3308  ;;  %v2356_v44 = vsel %vm2355_vm4, %v5009_v59, %v2352_v52  ;;  %v2357_v41 = vsel %vm2355_vm4, %v2352_v52, %v5065_v39  ;;  %4355 = vmatmul.mubr.msk.f32.vlgmr.msra.gmra.mrb[2].mxu1 %vm316_vm1, %v4352_v29  ;;  %v2539_v59 = vrot.slane %v2535_v27, %v4885_v22 }
 0x26f   : > { %v3313_v63 = vsel %vm3312_vm9, %v5013_v37, %v3309_v49  ;;  %v3314_v42 = vsel %vm3312_vm9, %v3309_v49, %v4953_v28  ;;  %v2360_v61 = vsel %vm5270_vm14, 0.0, %v2356_v44  ;;  %v2361_v62 = vsel %vm5274_vm15, 0.0, %v2357_v41  ;;  %4349 = vmatmul.mubr.msk.f32.vlgmr.msra.gmra.mrb[2].mxu0 %vm316_vm1, %v4346_v26  ;;  %v4389_v28 = vld [vmem:[%s5557_s4 + $0x70] sm:$0xf]  ;;  %2526 = vmatprep.mubr.f32.mxu1 %v4545_v0 }
 0x270   : > { %4390 = vmatprep.subr.msk.mxu0 %vm320_vm0, %v3314_v42  ;;  %4356 = vmatprep.subr.msk.mxu1 %vm320_vm0, %v2361_v62  ;;  %v2543_v37 = vrot.slane %v2535_v27, %v4887_v23  ;;  %v3279_v39 = vrot.slane %v3275_v36, %v4885_v22  ;;  %vm5322_vm8 = vcmp.eq.s32.totalorder %v2539_v59, 1  ;;  %v4363_v27 = vld [vmem:[%s5557_s4 + $0x54] sm:$0xf]  ;;  %v4367_v62 = vld [vmem:[%s5557_s4 + $0x58] sm:$0xf] }
 0x271   : > { %4391 = vmatpush1.msk.msra.mxu0 %vm320_vm0, %v3313_v63  ;;  %v5310_v57 = vpop.permute.xlu0 %3699  ;;  %4357 = vmatpush1.msk.msra.mxu1 %vm320_vm0, %v2360_v61 }
 0x272   : > { %3386 = vmatprep.mubr.f32.mxu0 %v4545_v0  ;;  %v5314_v50 = vpop.permute.xlu1 %2759  ;;  %vm5326_vm10 = vcmp.eq.s32.totalorder %v2543_v37, 1  ;;  %vm5330_vm2 = vcmp.eq.s32.totalorder %v3279_v39, 1 }
 0x273   : > { %4392 = vmatmul.mubr.msk.f32.vlgmr.msra.gmra.mrb[4].mxu0 %vm316_vm1, %v4389_v28 }
 0x274   : > { %3466 = vmatprep.mubr.f32.mxu0 %v4545_v0 }
 0x275   : > { %v2552_v47 = vpop.permute.xlu0 %2551 }
 0x276   : > { %v3292_v58 = vpop.permute.xlu1 %3291  ;;  %v2556_v5 = vsel %vm2555_vm12, %v5102_v3, %v2552_v47  ;;  %v2557_v6 = vsel %vm2555_vm12, %v2552_v47, %v5142_v12  ;;  %4358 = vmatmul.mubr.msk.f32.vlgmr.msra.gmra.mrb[2].mxu1 %vm316_vm1, %v4351_v54  ;;  %v3483_v12 = vrot.slane %v3475_v60, %v4887_v23  ;;  %vm3597_vm12 = vcmask 424960  }
 0x277   : > { %v3296_v13 = vsel %vm3295_vm7, %v5105_v18, %v3292_v58  ;;  %v3297_v25 = vsel %vm3295_vm7, %v3292_v58, %v5061_v1  ;;  %v2560_v53 = vsel %vm5322_vm8, 0.0, %v2556_v5  ;;  %v2561_v19 = vsel %vm5326_vm10, 0.0, %v2557_v6  ;;  %2637 = vmatprep.mubr.f32.mxu1 %v4545_v0  ;;  %v4388_v1 = vld [vmem:[%s5557_s4 + $0x6c] sm:$0xf]  ;;  %v4404_v58 = vld [vmem:[%s5557_s4 + $0x7c] sm:$0xf] }
 0x278   : > { %v3300_v2 = vsel %vm5330_vm2, 0.0, %v3296_v13  ;;  %v3301_v3 = vsel %vm5334_vm5, 0.0, %v3297_v25  ;;  %4360 = vmatprep.subr.msk.mxu1 %vm320_vm0, %v2561_v19  ;;  %v3479_v18 = vrot.slane %v3475_v60, %v4885_v22  ;;  %vm5373_vm11 = vcmp.eq.s32.totalorder %v3483_v12, 1  ;;  %v4371_v5 = vld [vmem:[%s5557_s4 + $0x5c] sm:$0xf] }
 0x279   : > { %4393 = vmatprep.subr.msk.mxu0 %vm320_vm0, %v3301_v3  ;;  %v2849_v34 = vpop.permute.xlu0 %2848  ;;  %4361 = vmatpush1.msk.msra.mxu1 %vm320_vm0, %v2560_v53 }
 0x27a   : > { %4394 = vmatpush1.msk.msra.mxu0 %vm320_vm0, %v3300_v2  ;;  %v3696_v32 = vpop.permute.xlu1 %3695  ;;  %vm5369_vm4 = vcmp.eq.s32.totalorder %v3479_v18, 1 }
 0x27b   : > { %4395 = vmatmul.mubr.msk.f32.vlgmr.msra.gmra.mrb[4].mxu0 %vm316_vm1, %v4388_v1 }
 0x27c   : > { %3577 = vmatprep.mubr.f32.mxu0 %v4545_v0 }
 0x27d   : > { %v2654_v23 = vpop.permute.xlu0 %2653 }
 0x27e   : > { %v3492_v48 = vpop.permute.xlu1 %3491  ;;  %v2658_v30 = vsel %vm2657_vm6, %v5178_v11, %v2654_v23  ;;  %v2659_v21 = vsel %vm2657_vm6, %v2654_v23, %v5211_v14  ;;  %4362 = vmatmul.mubr.msk.f32.vlgmr.msra.gmra.mrb[2].mxu1 %vm316_vm1, %v4359_v17  ;;  %vm2854_vm6 = vcmask 367616  }
 0x27f   : > { %v3496_v40 = vsel %vm3495_vm3, %v5182_v35, %v3492_v48  ;;  %v3497_v4 = vsel %vm3495_vm3, %v3492_v48, %v5139_v7  ;;  %v2662_v15 = vsel %vm5270_vm14, 0.0, %v2658_v30  ;;  %v2663_v29 = vsel %vm5274_vm15, 0.0, %v2659_v21  ;;  %2739 = vmatprep.mubr.f32.mxu1 %v4545_v0  ;;  %v4396_v7 = vld [vmem:[%s5557_s4 + $0x74] sm:$0xf] }
 0x280   : > { %v3500_v26 = vsel %vm5369_vm4, 0.0, %v3496_v40  ;;  %v3501_v11 = vsel %vm5373_vm11, 0.0, %v3497_v4  ;;  %4364 = vmatprep.subr.msk.mxu1 %vm320_vm0, %v2663_v29  ;;  %v4412_v40 = vld [vmem:[%s5557_s4 + $0x84] sm:$0xf] }
 0x281   : > { %4397 = vmatprep.subr.msk.mxu0 %vm320_vm0, %v3501_v11  ;;  %v3793_v35 = vpop.permute.xlu0 %3792  ;;  %4365 = vmatpush1.msk.msra.mxu1 %vm320_vm0, %v2662_v15  ;;  %v4416_v11 = vld [vmem:[%s5557_s4 + $0x88] sm:$0xf] }
 0x282   : > { %4398 = vmatpush1.msk.msra.mxu0 %vm320_vm0, %v3500_v26  ;;  %v2853_v14 = vpop.permute.xlu1 %2852 }
 0x283   : > { %4399 = vmatmul.mubr.msk.f32.vlgmr.msra.gmra.mrb[4].mxu0 %vm316_vm1, %v4396_v7 }
 0x284   : > { %3679 = vmatprep.mubr.f32.mxu0 %v4545_v0 }
 0x285   : > { %v2758_v52 = vpop.permute.xlu0 %2757 }
 0x286   : > { %v3594_v49 = vpop.permute.xlu1 %3593  ;;  %v2761_v36 = vsel %vm866_vm13, %v5251_v43, %v2758_v52  ;;  %v2762_v44 = vsel %vm866_vm13, %v2758_v52, %v5314_v50  ;;  %4366 = vmatmul.mubr.msk.f32.vlgmr.msra.gmra.mrb[2].mxu1 %vm316_vm1, %v4363_v27 }
 0x287   : > { %v3598_v41 = vsel %vm3597_vm12, %v5236_v56, %v3594_v49  ;;  %v3599_v63 = vsel %vm3597_vm12, %v3594_v49, %v5208_v51  ;;  %4368 = vmatprep.subr.msk.mxu1 %vm320_vm0, %v2762_v44  ;;  %2834 = vmatprep.mubr.f32.mxu1 %v4545_v0  ;;  %v4400_v56 = vld [vmem:[%s5557_s4 + $0x78] sm:$0xf]  ;;  %vm3794_vm12 = vcmask 359424  }
 0x288   : > { %v3602_v42 = vsel %vm5330_vm2, 0.0, %v3598_v41  ;;  %v3603_v61 = vsel %vm5334_vm5, 0.0, %v3599_v63  ;;  %4369 = vmatpush1.msk.msra.mxu1 %vm320_vm0, %v2761_v36  ;;  %v4383_v36 = vld [vmem:[%s5557_s4 + $0x68] sm:$0xf] }
 0x289   : > { %4401 = vmatprep.subr.msk.mxu0 %vm320_vm0, %v3603_v61  ;;  %v2951_v43 = vpop.permute.xlu0 %2950 }
 0x28a   : > { %4402 = vmatpush1.msk.msra.mxu0 %vm320_vm0, %v3602_v42  ;;  %v3789_v51 = vpop.permute.xlu1 %3788 }
 0x28b   : > { %4403 = vmatmul.mubr.msk.f32.vlgmr.msra.gmra.mrb[4].mxu0 %vm316_vm1, %v4400_v56 }
 0x28c   : > { %3774 = vmatprep.mubr.f32.mxu0 %v4545_v0 }
 0x28d   : > { %v2851_v59 = vpop.permute.xlu0 %2850 }
 0x28e   : > { %v3698_v28 = vpop.permute.xlu1 %3697  ;;  %v2855_v37 = vsel %vm2854_vm6, %v2849_v34, %v2851_v59  ;;  %v2856_v39 = vsel %vm2854_vm6, %v2851_v59, %v2853_v14  ;;  %4370 = vmatmul.mubr.msk.f32.vlgmr.msra.gmra.mrb[2].mxu1 %vm316_vm1, %v4367_v62 }
 0x28f   : > { %v3701_v33 = vsel %vm866_vm13, %v3696_v32, %v3698_v28  ;;  %v3702_v50 = vsel %vm866_vm13, %v3698_v28, %v5310_v57  ;;  %v2859_v54 = vsel %vm5322_vm8, 0.0, %v2855_v37  ;;  %v2860_v47 = vsel %vm5326_vm10, 0.0, %v2856_v39  ;;  %2936 = vmatprep.mubr.f32.mxu1 %v4545_v0  ;;  %v4375_v32 = vld [vmem:[%s5557_s4 + $0x60] sm:$0xf] }
 0x290   : > { %4405 = vmatprep.subr.msk.mxu0 %vm320_vm0, %v3702_v50  ;;  %4372 = vmatprep.subr.msk.mxu1 %vm320_vm0, %v2860_v47  ;;  %vm2956_vm13 = vcmask 23552  }
 0x291   : > { %4406 = vmatpush1.msk.msra.mxu0 %vm320_vm0, %v3701_v33  ;;  %v3895_v60 = vpop.permute.xlu0 %3894  ;;  %4373 = vmatpush1.msk.msra.mxu1 %vm320_vm0, %v2859_v54 }
 0x292   : > { %v2955_v57 = vpop.permute.xlu1 %2954 }
 0x293   : > { %4407 = vmatmul.mubr.msk.f32.vlgmr.msra.gmra.mrb[4].mxu0 %vm316_vm1, %v4404_v58 }
 0x294   : > { %3876 = vmatprep.mubr.f32.mxu0 %v4545_v0 }
 0x295   : > { %v2953_v6 = vpop.permute.xlu0 %2952 }
 0x296   : > { %v3791_v13 = vpop.permute.xlu1 %3790  ;;  %v2957_v25 = vsel %vm2956_vm13, %v2951_v43, %v2953_v6  ;;  %v2958_v53 = vsel %vm2956_vm13, %v2953_v6, %v2955_v57  ;;  %4374 = vmatmul.mubr.msk.f32.vlgmr.msra.gmra.mrb[2].mxu1 %vm316_vm1, %v4371_v5 }
 0x297   : > { %v3795_v19 = vsel %vm3794_vm12, %v3789_v51, %v3791_v13  ;;  %v3796_v2 = vsel %vm3794_vm12, %v3791_v13, %v3793_v35  ;;  %v2961_v3 = vsel %vm5270_vm14, 0.0, %v2957_v25  ;;  %v2962_v1 = vsel %vm5274_vm15, 0.0, %v2958_v53  ;;  %3038 = vmatprep.mubr.f32.mxu1 %v4545_v0 }
 0x298   : > { %v3799_v18 = vsel %vm5369_vm4, 0.0, %v3795_v19  ;;  %v3800_v12 = vsel %vm5373_vm11, 0.0, %v3796_v2  ;;  %4376 = vmatprep.subr.msk.mxu1 %vm320_vm0, %v2962_v1  ;;  %vm3143_vm14 = vcmask 1022976  }
 0x299   : > { %4409 = vmatprep.subr.msk.mxu0 %vm320_vm0, %v3800_v12  ;;  %v3994_v34 = vpop.permute.xlu0 %3993  ;;  %4377 = vmatpush1.msk.msra.mxu1 %vm320_vm0, %v2961_v3 }
 0x29a   : > { %4410 = vmatpush1.msk.msra.mxu0 %vm320_vm0, %v3799_v18  ;;  %v3891_v24 = vpop.permute.xlu1 %3890  ;;  %4380 = vmatprep.subr.msk.mxu1 %vm320_vm0, %v4925_v46 }
 0x29b   : > { %4411 = vmatmul.mubr.msk.f32.vlgmr.msra.gmra.mrb[4].mxu0 %vm316_vm1, %v4408_v55 }
 0x29c   : > { %3977 = vmatprep.mubr.f32.mxu0 %v4545_v0 }
 0x29d   : > { %v3142_v17 = vpop.permute.xlu0 %3141 }
 0x29e   : > { %v3893_v23 = vpop.permute.xlu1 %3892  ;;  %4378 = vmatmul.mubr.msk.f32.vlgmr.msra.gmra.mrb[2].mxu1 %vm316_vm1, %v4375_v32 }
 0x29f   : > { %v3896_v48 = vsel %vm3295_vm7, %v3891_v24, %v3893_v23  ;;  %v3897_v30 = vsel %vm3295_vm7, %v3893_v23, %v3895_v60  ;;  %4381 = vmatpush1.msk.msra.mxu1 %vm320_vm0, %v4902_v31  ;;  %3123 = vmatprep.mubr.f32.mxu1 %v4545_v0 }
 0x2a0   : > { %v3900_v46 = vsel %vm5330_vm2, 0.0, %v3896_v48  ;;  %v3901_v21 = vsel %vm5334_vm5, 0.0, %v3897_v30 }
 0x2a1   : > { %4413 = vmatprep.subr.msk.mxu0 %vm320_vm0, %v3901_v21  ;;  %v3996_v4 = vpop.permute.xlu0 %3995 }
 0x2a2   : > { %4414 = vmatpush1.msk.msra.mxu0 %vm320_vm0, %v3900_v46  ;;  %v3998_v15 = vpop.permute.xlu1 %3997  ;;  %v3999_v31 = vsel %vm3312_vm9, %v3994_v34, %v3996_v4 }
 0x2a3   : > { %v4000_v45 = vsel %vm3312_vm9, %v3996_v4, %v3998_v15  ;;  %4415 = vmatmul.mubr.msk.f32.vlgmr.msra.gmra.mrb[4].mxu0 %vm316_vm1, %v4412_v40 }
 0x2a4   : > { %4417 = vmatprep.subr.msk.mxu0 %vm320_vm0, %v4000_v45  ;;  %4072 = vmatprep.mubr.f32.mxu0 %v4545_v0 }
 0x2a5   : > { %4418 = vmatpush1.msk.msra.mxu0 %vm320_vm0, %v3999_v31  ;;  %v4089_v29 = vpop.permute.xlu0 %4088 }
 0x2a6   : > { %v3138_v26 = vpop.permute.xlu1 %3137  ;;  %4382 = vmatmul.mubr.msk.f32.vlgmr.msra.gmra.mrb[2].mxu1 %vm316_vm1, %v4379_v16 }
 0x2a7   : > { %3225 = vmatprep.mubr.f32.mxu1 %v4545_v0 }
 0x2a9   : > { %v4087_v35 = vpop.permute.xlu0 %4086 }
 0x2aa   : > { %v3140_v7 = vpop.permute.xlu1 %3139  ;;  %v4092_v44 = vsel %vm3495_vm3, %v4087_v35, %v4089_v29 }
 0x2ab   : > { %v3144_v14 = vsel %vm3143_vm14, %v3138_v26, %v3140_v7  ;;  %v3145_v27 = vsel %vm3143_vm14, %v3140_v7, %v3142_v17  ;;  %4419 = vmatmul.mubr.msk.f32.vlgmr.msra.gmra.mrb[4].mxu0 %vm316_vm1, %v4416_v11  ;;  %v4096_v63 = vsel %vm5369_vm4, 0.0, %v4092_v44 }
 0x2ac   : > { %v3148_v52 = vsel %vm5322_vm8, 0.0, %v3144_v14  ;;  %v3149_v49 = vsel %vm5326_vm10, 0.0, %v3145_v27  ;;  %4173 = vmatprep.mubr.f32.mxu0 %v4545_v0  ;;  %v4420_v0 = vld [vmem:[%s5557_s4 + $0x8c] sm:$0xf] }
 0x2ad   : > { %4384 = vmatprep.subr.msk.mxu1 %vm320_vm0, %v3149_v49 }
 0x2ae   : > { %4385 = vmatpush1.msk.msra.mxu1 %vm320_vm0, %v3148_v52  ;;  %v4091_v41 = vpop.permute.xlu1 %4090 }
 0x2af   : > { %v4093_v20 = vsel %vm3495_vm3, %v4089_v29, %v4091_v41  ;;  %4386 = vmatmul.mubr.msk.f32.vlgmr.msra.gmra.mrb[2].mxu1 %vm316_vm1, %v4383_v36 }
 0x2b0   : > { %v4097_v38 = vsel %vm5373_vm11, 0.0, %v4093_v20 }
 0x2b1   : > { %4421 = vmatprep.subr.msk.mxu0 %vm320_vm0, %v4097_v38 }
 0x2b2   : > { %4422 = vmatpush1.msk.msra.mxu0 %vm320_vm0, %v4096_v63 }
 0x2b3   : > { %4423 = vmatmul.mubr.msk.f32.vlgmr.msra.gmra.mrb[4].mxu0 %vm316_vm1, %v4420_v0 }
 0x2ba   : > { %v3239_v42 = vpop.permute.xlu0 %3238 }
 0x2be   : > { %v5528_v61 = vpop.permute.xlu0 %4186 }
 0x2bf   : > { %v1355_v56 = vpop.permute.xlu1 %1354 }
 0x2c2   : > { %v3249_v22 = vpop.permute.xlu0 %3248 }
 0x2c3   : > { %v2305_v43 = vpop.permute.xlu1 %2304 }
 0x2c6   : > { %v1373_v51 = vpop.permute.xlu0 %1372 }
 0x2c7   : > { %v1365_v62 = vpop.permute.xlu1 %1364 }
 0x2ca   : > { %v3257_v9 = vpop.permute.xlu0 %3256 }
 0x2cb   : > { %v400_v59 = vpop.permute.xlu1 %399 }
 0x2cc   : > { %v402_v28 = vmul.f32 %v400_v59, %v4652_v8  ;;  %v403_v37 = vmul.f32 %v400_v59, %v4654_v10 }
 0x2ce   : > { %v408_v39 = vpop.permute.xlu0 %407 }
 0x2cf   : > { %v410_v33 = vadd.f32 %v408_v39, %v402_v28  ;;  %v411_v50 = vadd.f32 %v408_v39, %v403_v37  ;;  %v2315_v58 = vpop.permute.xlu1 %2314 }
 0x2d1   : > { %v412_v54 = vmax.f32 %v410_v33, 0.0  ;;  %v413_v47 = vmax.f32 %v411_v50, 0.0 }
 0x2d3   : > { %414 = vst [vmem:[%s5536_s9] sm:$0xf] %v412_v54  ;;  %415 = vst [vmem:[%s5536_s9 + $0x8] sm:$0xf] %v413_v47  ;;  %v4197_v6 = vpop.permute.xlu1 %4196 }
 0x2d7   : > { %v2323_v32 = vpop.permute.xlu1 %2322 }
 0x33d   : > { %v1344_v60 = vpop.f32.mrb[0].mxu1 }
 0x33e   : > { %v1357_v57 = vadd.f32 %v1355_v56, %v1344_v60  ;;  %v1346_v8 = vpop.f32.mrb[1].mxu1 }
 0x33f   : > { %v1358_v5 = vadd.f32 %v1355_v56, %v1346_v8 }
 0x340   : > { %v1359_v10 = vmax.f32 %v1357_v57, 0.0 }
 0x341   : > { %v1360_v13 = vmax.f32 %v1358_v5, 0.0 }
 0x342   : > { %v1367_v25 = vmul.f32 %v1365_v62, %v1359_v10  ;;  %v2293_v53 = vpop.f32.mrb[2].mxu0 }
 0x343   : > { %v1368_v19 = vmul.f32 %v1365_v62, %v1360_v13  ;;  %v2307_v2 = vadd.f32 %v2305_v43, %v2293_v53  ;;  %v2295_v3 = vpop.f32.mrb[3].mxu0 }
 0x344   : > { %v1375_v1 = vadd.f32 %v1373_v51, %v1367_v25  ;;  %v2308_v18 = vadd.f32 %v2305_v43, %v2295_v3 }
 0x345   : > { %v1376_v12 = vadd.f32 %v1373_v51, %v1368_v19  ;;  %v2309_v55 = vmax.f32 %v2307_v2, 0.0 }
 0x346   : > { %v1377_v34 = vmax.f32 %v1375_v1, 0.0  ;;  %v2310_v24 = vmax.f32 %v2308_v18, 0.0 }
 0x347   : > { %v1378_v17 = vmax.f32 %v1376_v12, 0.0  ;;  %v2317_v23 = vmul.f32 %v2315_v58, %v2309_v55 }
 0x348   : > { %v1381_v48 = vrot.slane %v1377_v34, 4  ;;  %v2318_v30 = vmul.f32 %v2315_v58, %v2310_v24 }
 0x349   : > { %v1382_v46 = vrot.slane %v1378_v17, 4  ;;  %v2325_v21 = vadd.f32 %v2323_v32, %v2317_v23 }
 0x34a   : > { %1385 = vst [vmem:[%s5536_s9] sm:$0xf0] %v1381_v48  ;;  %v2326_v40 = vadd.f32 %v2323_v32, %v2318_v30 }
 0x34b   : > { %1386 = vst [vmem:[%s5536_s9 + $0x8] sm:$0xf0] %v1382_v46  ;;  %v2327_v4 = vmax.f32 %v2325_v21, 0.0 }
 0x34c   : > { %v2328_v15 = vmax.f32 %v2326_v40, 0.0 }
 0x34d   : > { %2329 = vst [vmem:[%s5536_s9 + $0x10] sm:$0xf] %v2327_v4 }
 0x34e   : > { %2330 = vst [vmem:[%s5536_s9 + $0x18] sm:$0xf] %v2328_v15 }
 0x382   : > { %v3227_v31 = vpop.f32.mrb[2].mxu1 }
 0x383   : > { %v3241_v45 = vadd.f32 %v3239_v42, %v3227_v31  ;;  %v3229_v16 = vpop.f32.mrb[3].mxu1 }
 0x384   : > { %v3242_v29 = vadd.f32 %v3239_v42, %v3229_v16  ;;  %v4205_v42 = vpop.permute.xlu0 %4204 }
 0x385   : > { %v3243_v26 = vmax.f32 %v3241_v45, 0.0 }
 0x386   : > { %v3244_v11 = vmax.f32 %v3242_v29, 0.0  ;;  %v4175_v35 = vpop.f32.mrb[4].mxu0 }
 0x387   : > { %v3251_v7 = vmul.f32 %v3249_v22, %v3243_v26  ;;  %v4189_v27 = vadd.f32 %v5528_v61, %v4175_v35  ;;  %v4177_v52 = vpop.f32.mrb[5].mxu0 }
 0x388   : > { %v3252_v14 = vmul.f32 %v3249_v22, %v3244_v11  ;;  %v4190_v36 = vadd.f32 %v5528_v61, %v4177_v52 }
 0x389   : > { %v3259_v49 = vadd.f32 %v3257_v9, %v3251_v7  ;;  %v4191_v41 = vmax.f32 %v4189_v27, 0.0 }
 0x38a   : > { %v3260_v44 = vadd.f32 %v3257_v9, %v3252_v14  ;;  %v4192_v38 = vmax.f32 %v4190_v36, 0.0 }
 0x38b   : > { %v3261_v20 = vmax.f32 %v3259_v49, 0.0  ;;  %v4199_v0 = vmul.f32 %v4197_v6, %v4191_v41 }
 0x38c   : > { %v3262_v63 = vmax.f32 %v3260_v44, 0.0  ;;  %v4200_v43 = vmul.f32 %v4197_v6, %v4192_v38 }
 0x38d   : > { %v3265_v56 = vrot.slane %v3261_v20, 4  ;;  %v4207_v51 = vadd.f32 %v4205_v42, %v4199_v0 }
 0x38e   : > { %v3266_v22 = vrot.slane %v3262_v63, 4  ;;  %v4208_v62 = vadd.f32 %v4205_v42, %v4200_v43 }
 0x38f   : > { %3269 = vst [vmem:[%s5536_s9 + $0x10] sm:$0xf0] %v3265_v56  ;;  %v4209_v59 = vmax.f32 %v4207_v51, 0.0 }
 0x390   : > { %3270 = vst [vmem:[%s5536_s9 + $0x18] sm:$0xf0] %v3266_v22  ;;  %v4210_v28 = vmax.f32 %v4208_v62, 0.0 }
 0x391   : > { %4211 = vst [vmem:[%s5536_s9 + $0x20] sm:$0xf] %v4209_v59 }
 0x392   : > { %4212 = vst [vmem:[%s5536_s9 + $0x28] sm:$0xf] %v4210_v28 }
 0x393 PF: > { %s18_s27 = sadd.s32 1, %s4543_s27  }
 0x394   : > { %p15_p4 = scmp.ge.s32.totalorder %s18_s27, 4  }
 0x396   :  { %17 = sbr.rel (!%p15_p4) target bundleno = 1 (0x1), region = 120 }

</bundles_post_ra>
